<compile_context>
chip_gen: v5e
topology: v5e:2x2
jax: 0.10.0
libtpu: 0.0.40
codegen_flags: <defaults>
</compile_context>

<pallas_src>
import jax
import jax.numpy as jnp
from jax import lax
from jax.experimental import pallas as pl
from jax.experimental.pallas import tpu as pltpu

# ---- small shapes consistent with the module ----
B = 2            # batch (number of links)
W = 8            # window_size == n_samples (attenuation sequence length)
F = 16           # per-sample features (stand-in for 90)
M = 8            # metadata_n_features
C = 32           # cnn_n_filters  (C // 2 = 16 for the correction head)
H = 32           # fc_hidden_size
CNN_LAYERS = 3
FC_LAYERS = 3
BW = B * W

# ---- lane-packed parameter buffer: [96, 128] f32, four 32-lane columns ----
LANES = 128
L0, L1, L2, L3 = 0, 32, 64, 96
# (row_start, lane_start) of each block
R_CW1,  LC_CW1  = 0,  L0        # [3C, C] im2col conv-1 weight (BN folded)
R_CW2,  LC_CW2  = 0,  L1        # [3C, C] im2col conv-2 weight
R_FW2,  LC_FW2  = 0,  L2        # [H, H]
R_FW3,  LC_FW3  = 32, L2        # [H, H]
R_HW1,  LC_HW1  = 64, L2        # [C, C//2]
R_HW2T, LC_HW2T = 64, L2 + 16   # [W, C//2]  (PyTorch layout)
R_FW1B, LC_FW1B = 0,  L3        # [M, H]
R_MW2,  LC_MW2  = 8,  L3        # [M, M]
R_CW0,  LC_CW0  = 16, L3        # [3, C]     (folded, Ci=1)
R_MW1,  LC_MW1  = 19, L3        # [2, M]
R_HB2,  LC_HB2  = 24, L3        # [W, 1]     (column layout)
R_CB0, R_CB1, R_CB2 = 32, 33, 34        # folded conv biases [C]   @ lanes L3
R_FB1, R_FB2, R_FB3 = 35, 36, 37        # FC biases          [H]   @ lanes L3
R_FW1A, R_FW4 = 38, 39                  # first-FC att col / final FC weight [H]
R_HB1 = 40                              # [C//2]
R_MB1, R_MB2 = 41, 42                   # [M]
R_FB4 = 43                              # [1]
R_TOTAL = 96                            # 48 KiB total (was 172 KiB)


def rain_kernel(rsl_ref, tsl_ref, meta_ref, p_ref, out_ref):
    def blk(r, n, l, w):                 # static parameter block slice (free)
        return p_ref[r:r + n, l:l + w]

    def vec(r, w):                       # single parameter row @ lane column 3
        return p_ref[r:r + 1, L3:L3 + w]

    # ---- 1) attenuation: ONE fused cross-lane reduction, kept sublane-major ----
    att = jnp.mean(tsl_ref[...] - rsl_ref[...], axis=-1, keepdims=True)   # (B, W, 1)
    att = att.reshape(BW, 1)                                              # flatten once

    # ---- conv taps: sublane rolls + window-boundary masks (no halo scratch) ----
    row_idx = lax.broadcasted_iota(jnp.int32, (BW, C), 0)
    not_first = (row_idx % W) != 0
    not_last = (row_idx % W) != (W - 1)

    def taps(x):                         # x: (BW, C); prev[t]=x[t-1], nxt[t]=x[t+1]
        prev = jnp.where(not_first, pltpu.roll(x, 1, axis=0), 0.0)
        nxt = jnp.where(not_last, pltpu.roll(x, BW - 1, axis=0), 0.0)
        return prev, nxt

    # ---- 2) CNN backbone: 3 x (Conv1d(k=3, pad=1) + folded BN + ReLU) ----
    # layer 0 (Ci = 1): pure VPU
    x0 = jnp.broadcast_to(att, (BW, C))
    p0, n0 = taps(x0)
    cw0 = blk(R_CW0, 3, LC_CW0, C)                                        # (3, C)
    x = jnp.maximum(p0 * cw0[0:1, :] + x0 * cw0[1:2, :] + n0 * cw0[2:3, :]
                    + vec(R_CB0, C), 0.0)                                 # (BW, C)

    # layers 1..2: one im2col MXU matmul each, [BW, 3C] @ [3C, C]
    for (rw, lw), rb in (((R_CW1, LC_CW1), R_CB1), ((R_CW2, LC_CW2), R_CB2)):
        pv, nx = taps(x)
        col = jnp.concatenate([pv, x, nx], axis=-1)                       # (BW, 3C)
        y = jnp.dot(col, blk(rw, 3 * C, lw, C),
                    preferred_element_type=jnp.float32)                   # (BW, C)
        x = jnp.maximum(y + vec(rb, C), 0.0)

    pooled = jnp.mean(x.reshape(B, W, C), axis=1)    # AdaptiveAvgPool1d(1) -> (B, C)

    # ---- 3) correction head: Linear -> ReLU -> Linear ----
    h = jnp.maximum(
        jnp.dot(pooled, blk(R_HW1, C, LC_HW1, C // 2),
                preferred_element_type=jnp.float32) + vec(R_HB1, C // 2), 0.0)
    hw2 = blk(R_HW2T, W, LC_HW2T, C // 2)                                 # (W, C//2)
    corr = (jnp.sum(h[:, None, :] * hw2[None, :, :], axis=-1, keepdims=True)
            + blk(R_HB2, W, LC_HB2, 1)[None])                             # (B, W, 1)
    clean = att - corr.reshape(BW, 1)                                     # (BW, 1)

    # ---- 4) FC metadata processor: SMEM scalars + VPU (no MXU, no lane tile) ----
    mb1 = vec(R_MB1, M)
    m1 = jnp.concatenate(
        [jnp.maximum(meta_ref[b, 0] * vec(R_MW1, M)
                     + meta_ref[b, 1] * vec(R_MW1 + 1, M) + mb1, 0.0)
         for b in range(B)], axis=0)                                      # (B, M)

    def small_matmul(xv, wm):            # tiny [B,K] @ [K,N] on the VPU
        acc = xv[:, 0:1] * wm[0:1, :]
        for k in range(1, wm.shape[0]):
            acc = acc + xv[:, k:k + 1] * wm[k:k + 1, :]
        return acc

    mf = jnp.maximum(small_matmul(m1, blk(R_MW2, M, LC_MW2, M))
                     + vec(R_MB2, M), 0.0)                                # (B, M)
    hm = small_matmul(mf, blk(R_FW1B, M, LC_FW1B, H))                     # (B, H)

    # ---- 5) FC rain head: layer 1 = att column + metadata rows (no lane concat) ----
    hf = jnp.maximum(clean.reshape(B, W, 1) * vec(R_FW1A, H)[None]
                     + hm[:, None, :] + vec(R_FB1, H)[None], 0.0)         # (B, W, H)
    hf = hf.reshape(BW, H)
    hf = jnp.maximum(jnp.dot(hf, blk(R_FW2, H, LC_FW2, H),
                             preferred_element_type=jnp.float32)
                     + vec(R_FB2, H), 0.0)
    hf = jnp.maximum(jnp.dot(hf, blk(R_FW3, H, LC_FW3, H),
                             preferred_element_type=jnp.float32)
                     + vec(R_FB3, H), 0.0)
    rain = (jnp.sum(hf * vec(R_FW4, H), axis=-1, keepdims=True)
            + vec(R_FB4, 1))                                              # (BW, 1)

    # ---- 6) four separate slice stores (no 4-wide lane-interleave concat) ----
    out_ref[0] = att.reshape(B, W, 1)
    out_ref[1] = corr
    out_ref[2] = clean.reshape(B, W, 1)
    out_ref[3] = rain.reshape(B, W, 1)


def init_params(key):
    """Raw parameters in PyTorch layouts, plus BatchNorm eval statistics."""
    keys = iter(jax.random.split(key, 40))

    def rnd(shape, scale=0.1):
        return scale * jax.random.normal(next(keys), shape, jnp.float32)

    p = {}
    in_ch = 1
    for i in range(CNN_LAYERS):
        p[f"conv{i}_w"] = rnd((C, in_ch, 3))          # Conv1d weight [Co, Ci, K]
        p[f"conv{i}_b"] = rnd((C,), 0.05)
        p[f"bn{i}_g"] = 1.0 + rnd((C,), 0.1)          # gamma
        p[f"bn{i}_b"] = rnd((C,), 0.05)               # beta
        p[f"bn{i}_rm"] = rnd((C,), 0.05)              # running_mean
        p[f"bn{i}_rv"] = 1.0 + jnp.abs(rnd((C,), 0.1))  # running_var
        in_ch = C
    p["hw1"], p["hb1"] = rnd((C // 2, C)), rnd((C // 2,), 0.05)
    p["hw2"], p["hb2"] = rnd((W, C // 2)), rnd((W,), 0.05)
    p["mw1"], p["mb1"] = rnd((M, 2)), rnd((M,), 0.05)
    p["mw2"], p["mb2"] = rnd((M, M)), rnd((M,), 0.05)
    p["fw1"], p["fb1"] = rnd((H, 1 + M)), rnd((H,), 0.05)
    p["fw2"], p["fb2"] = rnd((H, H)), rnd((H,), 0.05)
    p["fw3"], p["fb3"] = rnd((H, H)), rnd((H,), 0.05)
    p["fw4"], p["fb4"] = rnd((1, H)), rnd((1,), 0.05)
    return p


def pack_params(p):
    """Fold eval-mode BatchNorm into the convs and lane-pack into one [96,128] buffer."""
    eps = 1e-5
    buf = jnp.zeros((R_TOTAL, LANES), jnp.float32)

    folded = []
    for i in range(CNN_LAYERS):
        w, b = p[f"conv{i}_w"], p[f"conv{i}_b"]
        g, be, rm, rv = p[f"bn{i}_g"], p[f"bn{i}_b"], p[f"bn{i}_rm"], p[f"bn{i}_rv"]
        s = g / jnp.sqrt(rv + eps)
        folded.append((w * s[:, None, None], (b - rm) * s + be))
    (w0, b0), (w1, b1), (w2, b2) = folded

    def put(b_, arr, r, l):
        arr = jnp.asarray(arr, jnp.float32)
        return b_.at[r:r + arr.shape[0], l:l + arr.shape[1]].set(arr)

    buf = put(buf, jnp.transpose(w1, (2, 1, 0)).reshape(3 * C, C), R_CW1, LC_CW1)
    buf = put(buf, jnp.transpose(w2, (2, 1, 0)).reshape(3 * C, C), R_CW2, LC_CW2)
    buf = put(buf, jnp.transpose(w0, (2, 1, 0)).reshape(3, C), R_CW0, LC_CW0)
    buf = buf.at[R_CB0, L3:L3 + C].set(b0)
    buf = buf.at[R_CB1, L3:L3 + C].set(b1)
    buf = buf.at[R_CB2, L3:L3 + C].set(b2)

    buf = put(buf, p["hw1"].T, R_HW1, LC_HW1)                 # [C, C//2]
    buf = buf.at[R_HB1, L3:L3 + C // 2].set(p["hb1"])
    buf = put(buf, p["hw2"], R_HW2T, LC_HW2T)                 # [W, C//2] PyTorch layout
    buf = buf.at[R_HB2:R_HB2 + W, LC_HB2].set(p["hb2"])       # column layout

    buf = put(buf, p["mw1"].T, R_MW1, LC_MW1)                 # [2, M]
    buf = buf.at[R_MB1, L3:L3 + M].set(p["mb1"])
    buf = put(buf, p["mw2"].T, R_MW2, LC_MW2)                 # [M, M]
    buf = buf.at[R_MB2, L3:L3 + M].set(p["mb2"])

    buf = buf.at[R_FW1A, L3:L3 + H].set(p["fw1"][:, 0])
    buf = put(buf, p["fw1"][:, 1:].T, R_FW1B, LC_FW1B)        # [M, H]
    buf = buf.at[R_FB1, L3:L3 + H].set(p["fb1"])
    buf = put(buf, p["fw2"].T, R_FW2, LC_FW2)
    buf = buf.at[R_FB2, L3:L3 + H].set(p["fb2"])
    buf = put(buf, p["fw3"].T, R_FW3, LC_FW3)
    buf = buf.at[R_FB3, L3:L3 + H].set(p["fb3"])
    buf = buf.at[R_FW4, L3:L3 + H].set(p["fw4"][0])
    buf = buf.at[R_FB4, L3].set(p["fb4"][0])
    return buf


def cnn_fc_rain_estimator(rsl, tsl, metadata, pbuf):
    out = pl.pallas_call(
        rain_kernel,
        out_shape=jax.ShapeDtypeStruct((4, B, W, 1), jnp.float32),
        in_specs=[
            pl.BlockSpec(memory_space=pltpu.MemorySpace.VMEM),   # rsl
            pl.BlockSpec(memory_space=pltpu.MemorySpace.VMEM),   # tsl
            pl.BlockSpec(memory_space=pltpu.MemorySpace.SMEM),   # metadata (scalars)
            pl.BlockSpec(memory_space=pltpu.MemorySpace.VMEM),   # packed params
        ],
        out_specs=pl.BlockSpec(memory_space=pltpu.MemorySpace.VMEM),
    )(rsl, tsl, metadata, pbuf)
    raw = out[0, :, :, 0]
    corr = out[1, :, :, 0]
    clean = out[2, :, :, 0]
    rain = out[3, :, :, 0]
    return {
        "raw_attenuation": raw,
        "baseline_correction": corr,
        "clean_attenuation": clean,
        "rain_rate_samples": rain,
        "rain_rate_avg": rain,   # module returns the samples unchanged
    }


def reference(rsl, tsl, meta, p):
    """Faithful pure-JAX eval-mode forward (explicit BatchNorm, un-folded weights)."""
    eps = 1e-5
    hp = lax.Precision.HIGHEST
    att = jnp.mean(tsl, -1) - jnp.mean(rsl, -1)                   # [B, W]
    x = att[:, None, :]                                           # NCW [B, 1, W]
    for i in range(CNN_LAYERS):
        w, b = p[f"conv{i}_w"], p[f"conv{i}_b"]
        x = lax.conv_general_dilated(
            x, w, window_strides=(1,), padding=((1, 1),),
            dimension_numbers=("NCW", "OIW", "NCW"), precision=hp) + b[None, :, None]
        g, be, rm, rv = p[f"bn{i}_g"], p[f"bn{i}_b"], p[f"bn{i}_rm"], p[f"bn{i}_rv"]
        x = g[None, :, None] * (x - rm[None, :, None]) / jnp.sqrt(
            rv[None, :, None] + eps) + be[None, :, None]
        x = jnp.maximum(x, 0.0)                                   # Dropout(eval)=id
    pooled = jnp.mean(x, axis=-1)                                 # [B, C]
    h = jnp.maximum(jnp.dot(pooled, p["hw1"].T, precision=hp) + p["hb1"], 0.0)
    corr = jnp.dot(h, p["hw2"].T, precision=hp) + p["hb2"]
    clean = att - corr
    mf = jnp.maximum(jnp.dot(meta, p["mw1"].T, precision=hp) + p["mb1"], 0.0)
    mf = jnp.maximum(jnp.dot(mf, p["mw2"].T, precision=hp) + p["mb2"], 0.0)
    comb = jnp.concatenate(
        [clean[..., None], jnp.broadcast_to(mf[:, None, :], (B, W, M))],
        axis=-1).reshape(-1, 1 + M)
    hf = jnp.maximum(jnp.dot(comb, p["fw1"].T, precision=hp) + p["fb1"], 0.0)
    hf = jnp.maximum(jnp.dot(hf, p["fw2"].T, precision=hp) + p["fb2"], 0.0)
    hf = jnp.maximum(jnp.dot(hf, p["fw3"].T, precision=hp) + p["fb3"], 0.0)
    rain = (jnp.dot(hf, p["fw4"].T, precision=hp) + p["fb4"]).reshape(B, W)
    return att, corr, clean, rain


if __name__ == "__main__":
    key = jax.random.PRNGKey(0)
    k_rsl, k_tsl, k_meta, k_par = jax.random.split(key, 4)
    rsl = jax.random.normal(k_rsl, (B, W, F), jnp.float32)
    tsl = jax.random.normal(k_tsl, (B, W, F), jnp.float32) + 1.0
    metadata = jax.random.normal(k_meta, (B, 2), jnp.float32)
    params = init_params(k_par)
    pbuf = pack_params(params)

    out = cnn_fc_rain_estimator(rsl, tsl, metadata, pbuf)
    jax.block_until_ready(out)

    ref_att, ref_corr, ref_clean, ref_rain = reference(rsl, tsl, metadata, params)
    assert jnp.allclose(out["raw_attenuation"], ref_att, rtol=1e-3, atol=1e-3)
    assert jnp.allclose(out["baseline_correction"], ref_corr, rtol=1e-3, atol=1e-3)
    assert jnp.allclose(out["clean_attenuation"], ref_clean, rtol=1e-3, atol=1e-3)
    assert jnp.allclose(out["rain_rate_samples"], ref_rain, rtol=1e-3, atol=1e-3)

    print("KERNEL_OK")
</pallas_src>

<mosaic_0001>
module attributes {stable_mosaic.version = 11 : i64} {
  func.func @rain_kernel(%arg0: memref<2x8x16xf32, #tpu.memory_space<vmem>>, %arg1: memref<2x8x16xf32, #tpu.memory_space<vmem>>, %arg2: memref<2x2xf32, #tpu.memory_space<smem>>, %arg3: memref<96x128xf32, #tpu.memory_space<vmem>>, %arg4: memref<4x2x8x1xf32, #tpu.memory_space<vmem>>) attributes {dimension_semantics = [], scalar_prefetch = 0 : i64, scratch_operands = 0 : i64, tpu.core_type = #tpu.core_type<tc>} {
    %c0 = arith.constant 0 : index
    %c0_0 = arith.constant 0 : index
    %c0_1 = arith.constant 0 : index
    %0 = vector.load %arg1[%c0, %c0_0, %c0_1] : memref<2x8x16xf32, #tpu.memory_space<vmem>>, vector<2x8x16xf32>
    %c0_2 = arith.constant 0 : index
    %c0_3 = arith.constant 0 : index
    %c0_4 = arith.constant 0 : index
    %1 = vector.load %arg0[%c0_2, %c0_3, %c0_4] : memref<2x8x16xf32, #tpu.memory_space<vmem>>, vector<2x8x16xf32>
    %2 = arith.subf %0, %1 : vector<2x8x16xf32>
    %cst = arith.constant dense<0.000000e+00> : vector<2x8xf32>
    %3 = vector.multi_reduction <add>, %2, %cst [2] : vector<2x8x16xf32> to vector<2x8xf32>
    %4 = vector.shape_cast %3 : vector<2x8xf32> to vector<2x8x1xf32>
    %cst_5 = arith.constant 1.600000e+01 : f32
    %5 = vector.broadcast %cst_5 : f32 to vector<2x8x1xf32>
    %6 = arith.divf %4, %5 : vector<2x8x1xf32>
    %7 = vector.shape_cast %6 : vector<2x8x1xf32> to vector<16x1xf32>
    %8 = tpu.iota {dimensions = array<i32: 0>} : vector<16x32xi32>
    %c8_i32 = arith.constant 8 : i32
    %c0_i32 = arith.constant 0 : i32
    %9 = arith.cmpi eq, %c8_i32, %c0_i32 : i32
    %c1_i32 = arith.constant 1 : i32
    %10 = arith.select %9, %c1_i32, %c8_i32 : i32
    %11 = vector.broadcast %10 : i32 to vector<16x32xi32>
    %12 = arith.remsi %8, %11 : vector<16x32xi32>
    %c0_i32_6 = arith.constant 0 : i32
    %13 = vector.broadcast %c0_i32_6 : i32 to vector<16x32xi32>
    %14 = arith.cmpi ne, %12, %13 : vector<16x32xi32>
    %c0_i32_7 = arith.constant 0 : i32
    %15 = vector.broadcast %c0_i32_7 : i32 to vector<16x32xi32>
    %16 = arith.cmpi slt, %12, %15 : vector<16x32xi32>
    %c0_i32_8 = arith.constant 0 : i32
    %17 = arith.cmpi slt, %10, %c0_i32_8 : i32
    %18 = vector.broadcast %17 : i1 to vector<16x32xi1>
    %19 = vector.broadcast %18 : vector<16x32xi1> to vector<16x32xi1>
    %20 = arith.xori %16, %19 : vector<16x32xi1>
    %21 = arith.andi %20, %14 : vector<16x32xi1>
    %22 = vector.broadcast %10 : i32 to vector<16x32xi32>
    %23 = arith.addi %12, %22 : vector<16x32xi32>
    %24 = arith.select %21, %23, %12 : vector<16x32xi1>, vector<16x32xi32>
    %c0_i32_9 = arith.constant 0 : i32
    %25 = vector.broadcast %c0_i32_9 : i32 to vector<16x32xi32>
    %26 = arith.cmpi ne, %24, %25 : vector<16x32xi32>
    %c8_i32_10 = arith.constant 8 : i32
    %c0_i32_11 = arith.constant 0 : i32
    %27 = arith.cmpi eq, %c8_i32_10, %c0_i32_11 : i32
    %c1_i32_12 = arith.constant 1 : i32
    %28 = arith.select %27, %c1_i32_12, %c8_i32_10 : i32
    %29 = vector.broadcast %28 : i32 to vector<16x32xi32>
    %30 = arith.remsi %8, %29 : vector<16x32xi32>
    %c0_i32_13 = arith.constant 0 : i32
    %31 = vector.broadcast %c0_i32_13 : i32 to vector<16x32xi32>
    %32 = arith.cmpi ne, %30, %31 : vector<16x32xi32>
    %c0_i32_14 = arith.constant 0 : i32
    %33 = vector.broadcast %c0_i32_14 : i32 to vector<16x32xi32>
    %34 = arith.cmpi slt, %30, %33 : vector<16x32xi32>
    %c0_i32_15 = arith.constant 0 : i32
    %35 = arith.cmpi slt, %28, %c0_i32_15 : i32
    %36 = vector.broadcast %35 : i1 to vector<16x32xi1>
    %37 = vector.broadcast %36 : vector<16x32xi1> to vector<16x32xi1>
    %38 = arith.xori %34, %37 : vector<16x32xi1>
    %39 = arith.andi %38, %32 : vector<16x32xi1>
    %40 = vector.broadcast %28 : i32 to vector<16x32xi32>
    %41 = arith.addi %30, %40 : vector<16x32xi32>
    %42 = arith.select %39, %41, %30 : vector<16x32xi1>, vector<16x32xi32>
    %c7_i32 = arith.constant 7 : i32
    %43 = vector.broadcast %c7_i32 : i32 to vector<16x32xi32>
    %44 = arith.cmpi ne, %42, %43 : vector<16x32xi32>
    %45 = vector.shape_cast %7 : vector<16x1xf32> to vector<16x1xf32>
    %46 = vector.broadcast %45 : vector<16x1xf32> to vector<16x32xf32>
    %c1_i32_16 = arith.constant 1 : i32
    %47 = tpu.dynamic_rotate %46 by %c1_i32_16 dim 0 : vector<16x32xf32>, i32 -> vector<16x32xf32>
    %cst_17 = arith.constant 0.000000e+00 : f32
    %48 = vector.broadcast %cst_17 : f32 to vector<16x32xf32>
    %49 = arith.select %26, %47, %48 : vector<16x32xi1>, vector<16x32xf32>
    %c15_i32 = arith.constant 15 : i32
    %50 = tpu.dynamic_rotate %46 by %c15_i32 dim 0 : vector<16x32xf32>, i32 -> vector<16x32xf32>
    %cst_18 = arith.constant 0.000000e+00 : f32
    %51 = vector.broadcast %cst_18 : f32 to vector<16x32xf32>
    %52 = arith.select %44, %50, %51 : vector<16x32xi1>, vector<16x32xf32>
    %c16 = arith.constant 16 : index
    %c96 = arith.constant 96 : index
    %53 = vector.load %arg3[%c16, %c96] : memref<96x128xf32, #tpu.memory_space<vmem>>, vector<3x32xf32>
    %54 = vector.extract_strided_slice %53 {offsets = [0, 0], sizes = [1, 32], strides = [1, 1]} : vector<3x32xf32> to vector<1x32xf32>
    %55 = vector.broadcast %54 : vector<1x32xf32> to vector<16x32xf32>
    %56 = arith.mulf %49, %55 : vector<16x32xf32>
    %57 = vector.extract_strided_slice %53 {offsets = [1, 0], sizes = [1, 32], strides = [1, 1]} : vector<3x32xf32> to vector<1x32xf32>
    %58 = vector.broadcast %57 : vector<1x32xf32> to vector<16x32xf32>
    %59 = arith.mulf %46, %58 : vector<16x32xf32>
    %60 = arith.addf %56, %59 : vector<16x32xf32>
    %61 = vector.extract_strided_slice %53 {offsets = [2, 0], sizes = [1, 32], strides = [1, 1]} : vector<3x32xf32> to vector<1x32xf32>
    %62 = vector.broadcast %61 : vector<1x32xf32> to vector<16x32xf32>
    %63 = arith.mulf %52, %62 : vector<16x32xf32>
    %64 = arith.addf %60, %63 : vector<16x32xf32>
    %c32 = arith.constant 32 : index
    %c96_19 = arith.constant 96 : index
    %65 = vector.load %arg3[%c32, %c96_19] : memref<96x128xf32, #tpu.memory_space<vmem>>, vector<1x32xf32>
    %66 = vector.broadcast %65 : vector<1x32xf32> to vector<16x32xf32>
    %67 = arith.addf %64, %66 : vector<16x32xf32>
    %cst_20 = arith.constant 0.000000e+00 : f32
    %68 = vector.broadcast %cst_20 : f32 to vector<16x32xf32>
    %69 = arith.maximumf %67, %68 : vector<16x32xf32>
    %c1_i32_21 = arith.constant 1 : i32
    %70 = tpu.dynamic_rotate %69 by %c1_i32_21 dim 0 : vector<16x32xf32>, i32 -> vector<16x32xf32>
    %cst_22 = arith.constant 0.000000e+00 : f32
    %71 = vector.broadcast %cst_22 : f32 to vector<16x32xf32>
    %72 = arith.select %26, %70, %71 : vector<16x32xi1>, vector<16x32xf32>
    %c15_i32_23 = arith.constant 15 : i32
    %73 = tpu.dynamic_rotate %69 by %c15_i32_23 dim 0 : vector<16x32xf32>, i32 -> vector<16x32xf32>
    %cst_24 = arith.constant 0.000000e+00 : f32
    %74 = vector.broadcast %cst_24 : f32 to vector<16x32xf32>
    %75 = arith.select %44, %73, %74 : vector<16x32xi1>, vector<16x32xf32>
    %76 = tpu.concatenate %72, %69, %75 in 1 : vector<16x32xf32>, vector<16x32xf32>, vector<16x32xf32> -> vector<16x96xf32>
    %c0_25 = arith.constant 0 : index
    %c0_26 = arith.constant 0 : index
    %77 = vector.load %arg3[%c0_25, %c0_26] : memref<96x128xf32, #tpu.memory_space<vmem>>, vector<96x32xf32>
    %cst_27 = arith.constant dense<0.000000e+00> : vector<16x32xf32>
    %78 = tpu.matmul %76, %77, %cst_27 {dimension_numbers = #tpu.dot_dimension_numbers<[1], [0], [0], [1], [0, 0, 1, 1], [], []>} : vector<16x96xf32>, vector<96x32xf32>, vector<16x32xf32> -> vector<16x32xf32>
    %c33 = arith.constant 33 : index
    %c96_28 = arith.constant 96 : index
    %79 = vector.load %arg3[%c33, %c96_28] : memref<96x128xf32, #tpu.memory_space<vmem>>, vector<1x32xf32>
    %80 = vector.broadcast %79 : vector<1x32xf32> to vector<16x32xf32>
    %81 = arith.addf %78, %80 : vector<16x32xf32>
    %cst_29 = arith.constant 0.000000e+00 : f32
    %82 = vector.broadcast %cst_29 : f32 to vector<16x32xf32>
    %83 = arith.maximumf %81, %82 : vector<16x32xf32>
    %c1_i32_30 = arith.constant 1 : i32
    %84 = tpu.dynamic_rotate %83 by %c1_i32_30 dim 0 : vector<16x32xf32>, i32 -> vector<16x32xf32>
    %cst_31 = arith.constant 0.000000e+00 : f32
    %85 = vector.broadcast %cst_31 : f32 to vector<16x32xf32>
    %86 = arith.select %26, %84, %85 : vector<16x32xi1>, vector<16x32xf32>
    %c15_i32_32 = arith.constant 15 : i32
    %87 = tpu.dynamic_rotate %83 by %c15_i32_32 dim 0 : vector<16x32xf32>, i32 -> vector<16x32xf32>
    %cst_33 = arith.constant 0.000000e+00 : f32
    %88 = vector.broadcast %cst_33 : f32 to vector<16x32xf32>
    %89 = arith.select %44, %87, %88 : vector<16x32xi1>, vector<16x32xf32>
    %90 = tpu.concatenate %86, %83, %89 in 1 : vector<16x32xf32>, vector<16x32xf32>, vector<16x32xf32> -> vector<16x96xf32>
    %c0_34 = arith.constant 0 : index
    %c32_35 = arith.constant 32 : index
    %91 = vector.load %arg3[%c0_34, %c32_35] : memref<96x128xf32, #tpu.memory_space<vmem>>, vector<96x32xf32>
    %cst_36 = arith.constant dense<0.000000e+00> : vector<16x32xf32>
    %92 = tpu.matmul %90, %91, %cst_36 {dimension_numbers = #tpu.dot_dimension_numbers<[1], [0], [0], [1], [0, 0, 1, 1], [], []>} : vector<16x96xf32>, vector<96x32xf32>, vector<16x32xf32> -> vector<16x32xf32>
    %c34 = arith.constant 34 : index
    %c96_37 = arith.constant 96 : index
    %93 = vector.load %arg3[%c34, %c96_37] : memref<96x128xf32, #tpu.memory_space<vmem>>, vector<1x32xf32>
    %94 = vector.broadcast %93 : vector<1x32xf32> to vector<16x32xf32>
    %95 = arith.addf %92, %94 : vector<16x32xf32>
    %cst_38 = arith.constant 0.000000e+00 : f32
    %96 = vector.broadcast %cst_38 : f32 to vector<16x32xf32>
    %97 = arith.maximumf %95, %96 : vector<16x32xf32>
    %98 = vector.shape_cast %97 : vector<16x32xf32> to vector<2x8x32xf32>
    %cst_39 = arith.constant dense<0.000000e+00> : vector<2x32xf32>
    %99 = vector.multi_reduction <add>, %98, %cst_39 [1] : vector<2x8x32xf32> to vector<2x32xf32>
    %cst_40 = arith.constant 8.000000e+00 : f32
    %100 = vector.broadcast %cst_40 : f32 to vector<2x32xf32>
    %101 = arith.divf %99, %100 : vector<2x32xf32>
    %c64 = arith.constant 64 : index
    %c64_41 = arith.constant 64 : index
    %102 = vector.load %arg3[%c64, %c64_41] : memref<96x128xf32, #tpu.memory_space<vmem>>, vector<32x16xf32>
    %cst_42 = arith.constant dense<0.000000e+00> : vector<2x16xf32>
    %103 = tpu.matmul %101, %102, %cst_42 {dimension_numbers = #tpu.dot_dimension_numbers<[1], [0], [0], [1], [0, 0, 1, 1], [], []>} : vector<2x32xf32>, vector<32x16xf32>, vector<2x16xf32> -> vector<2x16xf32>
    %c40 = arith.constant 40 : index
    %c96_43 = arith.constant 96 : index
    %104 = vector.load %arg3[%c40, %c96_43] : memref<96x128xf32, #tpu.memory_space<vmem>>, vector<1x16xf32>
    %105 = vector.broadcast %104 : vector<1x16xf32> to vector<2x16xf32>
    %106 = arith.addf %103, %105 : vector<2x16xf32>
    %cst_44 = arith.constant 0.000000e+00 : f32
    %107 = vector.broadcast %cst_44 : f32 to vector<2x16xf32>
    %108 = arith.maximumf %106, %107 : vector<2x16xf32>
    %c64_45 = arith.constant 64 : index
    %c80 = arith.constant 80 : index
    %109 = vector.load %arg3[%c64_45, %c80] : memref<96x128xf32, #tpu.memory_space<vmem>>, vector<8x16xf32>
    %110 = vector.shape_cast %108 : vector<2x16xf32> to vector<2x1x16xf32>
    %111 = vector.shape_cast %109 : vector<8x16xf32> to vector<1x8x16xf32>
    %112 = vector.broadcast %110 : vector<2x1x16xf32> to vector<2x8x16xf32>
    %113 = vector.broadcast %111 : vector<1x8x16xf32> to vector<2x8x16xf32>
    %114 = arith.mulf %112, %113 : vector<2x8x16xf32>
    %cst_46 = arith.constant dense<0.000000e+00> : vector<2x8xf32>
    %115 = vector.multi_reduction <add>, %114, %cst_46 [2] : vector<2x8x16xf32> to vector<2x8xf32>
    %116 = vector.shape_cast %115 : vector<2x8xf32> to vector<2x8x1xf32>
    %c24 = arith.constant 24 : index
    %c96_47 = arith.constant 96 : index
    %117 = vector.load %arg3[%c24, %c96_47] : memref<96x128xf32, #tpu.memory_space<vmem>>, vector<8x1xf32>
    %118 = vector.shape_cast %117 : vector<8x1xf32> to vector<1x8x1xf32>
    %119 = vector.broadcast %118 : vector<1x8x1xf32> to vector<2x8x1xf32>
    %120 = arith.addf %116, %119 : vector<2x8x1xf32>
    %121 = vector.shape_cast %120 : vector<2x8x1xf32> to vector<16x1xf32>
    %122 = arith.subf %7, %121 : vector<16x1xf32>
    %c41 = arith.constant 41 : index
    %c96_48 = arith.constant 96 : index
    %123 = vector.load %arg3[%c41, %c96_48] : memref<96x128xf32, #tpu.memory_space<vmem>>, vector<1x8xf32>
    %c0_49 = arith.constant 0 : index
    %c0_50 = arith.constant 0 : index
    %124 = memref.load %arg2[%c0_49, %c0_50] : memref<2x2xf32, #tpu.memory_space<smem>>
    %c19 = arith.constant 19 : index
    %c96_51 = arith.constant 96 : index
    %125 = vector.load %arg3[%c19, %c96_51] : memref<96x128xf32, #tpu.memory_space<vmem>>, vector<1x8xf32>
    %126 = vector.broadcast %124 : f32 to vector<1x8xf32>
    %127 = arith.mulf %126, %125 : vector<1x8xf32>
    %c0_52 = arith.constant 0 : index
    %c1 = arith.constant 1 : index
    %128 = memref.load %arg2[%c0_52, %c1] : memref<2x2xf32, #tpu.memory_space<smem>>
    %c20 = arith.constant 20 : index
    %c96_53 = arith.constant 96 : index
    %129 = vector.load %arg3[%c20, %c96_53] : memref<96x128xf32, #tpu.memory_space<vmem>>, vector<1x8xf32>
    %130 = vector.broadcast %128 : f32 to vector<1x8xf32>
    %131 = arith.mulf %130, %129 : vector<1x8xf32>
    %132 = arith.addf %127, %131 : vector<1x8xf32>
    %133 = arith.addf %132, %123 : vector<1x8xf32>
    %cst_54 = arith.constant 0.000000e+00 : f32
    %134 = vector.broadcast %cst_54 : f32 to vector<1x8xf32>
    %135 = arith.maximumf %133, %134 : vector<1x8xf32>
    %c1_55 = arith.constant 1 : index
    %c0_56 = arith.constant 0 : index
    %136 = memref.load %arg2[%c1_55, %c0_56] : memref<2x2xf32, #tpu.memory_space<smem>>
    %c19_57 = arith.constant 19 : index
    %c96_58 = arith.constant 96 : index
    %137 = vector.load %arg3[%c19_57, %c96_58] : memref<96x128xf32, #tpu.memory_space<vmem>>, vector<1x8xf32>
    %138 = vector.broadcast %136 : f32 to vector<1x8xf32>
    %139 = arith.mulf %138, %137 : vector<1x8xf32>
    %c1_59 = arith.constant 1 : index
    %c1_60 = arith.constant 1 : index
    %140 = memref.load %arg2[%c1_59, %c1_60] : memref<2x2xf32, #tpu.memory_space<smem>>
    %c20_61 = arith.constant 20 : index
    %c96_62 = arith.constant 96 : index
    %141 = vector.load %arg3[%c20_61, %c96_62] : memref<96x128xf32, #tpu.memory_space<vmem>>, vector<1x8xf32>
    %142 = vector.broadcast %140 : f32 to vector<1x8xf32>
    %143 = arith.mulf %142, %141 : vector<1x8xf32>
    %144 = arith.addf %139, %143 : vector<1x8xf32>
    %145 = arith.addf %144, %123 : vector<1x8xf32>
    %cst_63 = arith.constant 0.000000e+00 : f32
    %146 = vector.broadcast %cst_63 : f32 to vector<1x8xf32>
    %147 = arith.maximumf %145, %146 : vector<1x8xf32>
    %148 = tpu.concatenate %135, %147 in 0 : vector<1x8xf32>, vector<1x8xf32> -> vector<2x8xf32>
    %c8 = arith.constant 8 : index
    %c96_64 = arith.constant 96 : index
    %149 = vector.load %arg3[%c8, %c96_64] : memref<96x128xf32, #tpu.memory_space<vmem>>, vector<8x8xf32>
    %150 = vector.extract_strided_slice %148 {offsets = [0, 0], sizes = [2, 1], strides = [1, 1]} : vector<2x8xf32> to vector<2x1xf32>
    %151 = vector.extract_strided_slice %149 {offsets = [0, 0], sizes = [1, 8], strides = [1, 1]} : vector<8x8xf32> to vector<1x8xf32>
    %152 = vector.broadcast %150 : vector<2x1xf32> to vector<2x8xf32>
    %153 = vector.broadcast %151 : vector<1x8xf32> to vector<2x8xf32>
    %154 = arith.mulf %152, %153 : vector<2x8xf32>
    %155 = vector.extract_strided_slice %148 {offsets = [0, 1], sizes = [2, 1], strides = [1, 1]} : vector<2x8xf32> to vector<2x1xf32>
    %156 = vector.extract_strided_slice %149 {offsets = [1, 0], sizes = [1, 8], strides = [1, 1]} : vector<8x8xf32> to vector<1x8xf32>
    %157 = vector.broadcast %155 : vector<2x1xf32> to vector<2x8xf32>
    %158 = vector.broadcast %156 : vector<1x8xf32> to vector<2x8xf32>
    %159 = arith.mulf %157, %158 : vector<2x8xf32>
    %160 = arith.addf %154, %159 : vector<2x8xf32>
    %161 = vector.extract_strided_slice %148 {offsets = [0, 2], sizes = [2, 1], strides = [1, 1]} : vector<2x8xf32> to vector<2x1xf32>
    %162 = vector.extract_strided_slice %149 {offsets = [2, 0], sizes = [1, 8], strides = [1, 1]} : vector<8x8xf32> to vector<1x8xf32>
    %163 = vector.broadcast %161 : vector<2x1xf32> to vector<2x8xf32>
    %164 = vector.broadcast %162 : vector<1x8xf32> to vector<2x8xf32>
    %165 = arith.mulf %163, %164 : vector<2x8xf32>
    %166 = arith.addf %160, %165 : vector<2x8xf32>
    %167 = vector.extract_strided_slice %148 {offsets = [0, 3], sizes = [2, 1], strides = [1, 1]} : vector<2x8xf32> to vector<2x1xf32>
    %168 = vector.extract_strided_slice %149 {offsets = [3, 0], sizes = [1, 8], strides = [1, 1]} : vector<8x8xf32> to vector<1x8xf32>
    %169 = vector.broadcast %167 : vector<2x1xf32> to vector<2x8xf32>
    %170 = vector.broadcast %168 : vector<1x8xf32> to vector<2x8xf32>
    %171 = arith.mulf %169, %170 : vector<2x8xf32>
    %172 = arith.addf %166, %171 : vector<2x8xf32>
    %173 = vector.extract_strided_slice %148 {offsets = [0, 4], sizes = [2, 1], strides = [1, 1]} : vector<2x8xf32> to vector<2x1xf32>
    %174 = vector.extract_strided_slice %149 {offsets = [4, 0], sizes = [1, 8], strides = [1, 1]} : vector<8x8xf32> to vector<1x8xf32>
    %175 = vector.broadcast %173 : vector<2x1xf32> to vector<2x8xf32>
    %176 = vector.broadcast %174 : vector<1x8xf32> to vector<2x8xf32>
    %177 = arith.mulf %175, %176 : vector<2x8xf32>
    %178 = arith.addf %172, %177 : vector<2x8xf32>
    %179 = vector.extract_strided_slice %148 {offsets = [0, 5], sizes = [2, 1], strides = [1, 1]} : vector<2x8xf32> to vector<2x1xf32>
    %180 = vector.extract_strided_slice %149 {offsets = [5, 0], sizes = [1, 8], strides = [1, 1]} : vector<8x8xf32> to vector<1x8xf32>
    %181 = vector.broadcast %179 : vector<2x1xf32> to vector<2x8xf32>
    %182 = vector.broadcast %180 : vector<1x8xf32> to vector<2x8xf32>
    %183 = arith.mulf %181, %182 : vector<2x8xf32>
    %184 = arith.addf %178, %183 : vector<2x8xf32>
    %185 = vector.extract_strided_slice %148 {offsets = [0, 6], sizes = [2, 1], strides = [1, 1]} : vector<2x8xf32> to vector<2x1xf32>
    %186 = vector.extract_strided_slice %149 {offsets = [6, 0], sizes = [1, 8], strides = [1, 1]} : vector<8x8xf32> to vector<1x8xf32>
    %187 = vector.broadcast %185 : vector<2x1xf32> to vector<2x8xf32>
    %188 = vector.broadcast %186 : vector<1x8xf32> to vector<2x8xf32>
    %189 = arith.mulf %187, %188 : vector<2x8xf32>
    %190 = arith.addf %184, %189 : vector<2x8xf32>
    %191 = vector.extract_strided_slice %148 {offsets = [0, 7], sizes = [2, 1], strides = [1, 1]} : vector<2x8xf32> to vector<2x1xf32>
    %192 = vector.extract_strided_slice %149 {offsets = [7, 0], sizes = [1, 8], strides = [1, 1]} : vector<8x8xf32> to vector<1x8xf32>
    %193 = vector.broadcast %191 : vector<2x1xf32> to vector<2x8xf32>
    %194 = vector.broadcast %192 : vector<1x8xf32> to vector<2x8xf32>
    %195 = arith.mulf %193, %194 : vector<2x8xf32>
    %196 = arith.addf %190, %195 : vector<2x8xf32>
    %c42 = arith.constant 42 : index
    %c96_65 = arith.constant 96 : index
    %197 = vector.load %arg3[%c42, %c96_65] : memref<96x128xf32, #tpu.memory_space<vmem>>, vector<1x8xf32>
    %198 = vector.broadcast %197 : vector<1x8xf32> to vector<2x8xf32>
    %199 = arith.addf %196, %198 : vector<2x8xf32>
    %cst_66 = arith.constant 0.000000e+00 : f32
    %200 = vector.broadcast %cst_66 : f32 to vector<2x8xf32>
    %201 = arith.maximumf %199, %200 : vector<2x8xf32>
    %c0_67 = arith.constant 0 : index
    %c96_68 = arith.constant 96 : index
    %202 = vector.load %arg3[%c0_67, %c96_68] : memref<96x128xf32, #tpu.memory_space<vmem>>, vector<8x32xf32>
    %203 = vector.extract_strided_slice %201 {offsets = [0, 0], sizes = [2, 1], strides = [1, 1]} : vector<2x8xf32> to vector<2x1xf32>
    %204 = vector.extract_strided_slice %202 {offsets = [0, 0], sizes = [1, 32], strides = [1, 1]} : vector<8x32xf32> to vector<1x32xf32>
    %205 = vector.broadcast %203 : vector<2x1xf32> to vector<2x32xf32>
    %206 = vector.broadcast %204 : vector<1x32xf32> to vector<2x32xf32>
    %207 = arith.mulf %205, %206 : vector<2x32xf32>
    %208 = vector.extract_strided_slice %201 {offsets = [0, 1], sizes = [2, 1], strides = [1, 1]} : vector<2x8xf32> to vector<2x1xf32>
    %209 = vector.extract_strided_slice %202 {offsets = [1, 0], sizes = [1, 32], strides = [1, 1]} : vector<8x32xf32> to vector<1x32xf32>
    %210 = vector.broadcast %208 : vector<2x1xf32> to vector<2x32xf32>
    %211 = vector.broadcast %209 : vector<1x32xf32> to vector<2x32xf32>
    %212 = arith.mulf %210, %211 : vector<2x32xf32>
    %213 = arith.addf %207, %212 : vector<2x32xf32>
    %214 = vector.extract_strided_slice %201 {offsets = [0, 2], sizes = [2, 1], strides = [1, 1]} : vector<2x8xf32> to vector<2x1xf32>
    %215 = vector.extract_strided_slice %202 {offsets = [2, 0], sizes = [1, 32], strides = [1, 1]} : vector<8x32xf32> to vector<1x32xf32>
    %216 = vector.broadcast %214 : vector<2x1xf32> to vector<2x32xf32>
    %217 = vector.broadcast %215 : vector<1x32xf32> to vector<2x32xf32>
    %218 = arith.mulf %216, %217 : vector<2x32xf32>
    %219 = arith.addf %213, %218 : vector<2x32xf32>
    %220 = vector.extract_strided_slice %201 {offsets = [0, 3], sizes = [2, 1], strides = [1, 1]} : vector<2x8xf32> to vector<2x1xf32>
    %221 = vector.extract_strided_slice %202 {offsets = [3, 0], sizes = [1, 32], strides = [1, 1]} : vector<8x32xf32> to vector<1x32xf32>
    %222 = vector.broadcast %220 : vector<2x1xf32> to vector<2x32xf32>
    %223 = vector.broadcast %221 : vector<1x32xf32> to vector<2x32xf32>
    %224 = arith.mulf %222, %223 : vector<2x32xf32>
    %225 = arith.addf %219, %224 : vector<2x32xf32>
    %226 = vector.extract_strided_slice %201 {offsets = [0, 4], sizes = [2, 1], strides = [1, 1]} : vector<2x8xf32> to vector<2x1xf32>
    %227 = vector.extract_strided_slice %202 {offsets = [4, 0], sizes = [1, 32], strides = [1, 1]} : vector<8x32xf32> to vector<1x32xf32>
    %228 = vector.broadcast %226 : vector<2x1xf32> to vector<2x32xf32>
    %229 = vector.broadcast %227 : vector<1x32xf32> to vector<2x32xf32>
    %230 = arith.mulf %228, %229 : vector<2x32xf32>
    %231 = arith.addf %225, %230 : vector<2x32xf32>
    %232 = vector.extract_strided_slice %201 {offsets = [0, 5], sizes = [2, 1], strides = [1, 1]} : vector<2x8xf32> to vector<2x1xf32>
    %233 = vector.extract_strided_slice %202 {offsets = [5, 0], sizes = [1, 32], strides = [1, 1]} : vector<8x32xf32> to vector<1x32xf32>
    %234 = vector.broadcast %232 : vector<2x1xf32> to vector<2x32xf32>
    %235 = vector.broadcast %233 : vector<1x32xf32> to vector<2x32xf32>
    %236 = arith.mulf %234, %235 : vector<2x32xf32>
    %237 = arith.addf %231, %236 : vector<2x32xf32>
    %238 = vector.extract_strided_slice %201 {offsets = [0, 6], sizes = [2, 1], strides = [1, 1]} : vector<2x8xf32> to vector<2x1xf32>
    %239 = vector.extract_strided_slice %202 {offsets = [6, 0], sizes = [1, 32], strides = [1, 1]} : vector<8x32xf32> to vector<1x32xf32>
    %240 = vector.broadcast %238 : vector<2x1xf32> to vector<2x32xf32>
    %241 = vector.broadcast %239 : vector<1x32xf32> to vector<2x32xf32>
    %242 = arith.mulf %240, %241 : vector<2x32xf32>
    %243 = arith.addf %237, %242 : vector<2x32xf32>
    %244 = vector.extract_strided_slice %201 {offsets = [0, 7], sizes = [2, 1], strides = [1, 1]} : vector<2x8xf32> to vector<2x1xf32>
    %245 = vector.extract_strided_slice %202 {offsets = [7, 0], sizes = [1, 32], strides = [1, 1]} : vector<8x32xf32> to vector<1x32xf32>
    %246 = vector.broadcast %244 : vector<2x1xf32> to vector<2x32xf32>
    %247 = vector.broadcast %245 : vector<1x32xf32> to vector<2x32xf32>
    %248 = arith.mulf %246, %247 : vector<2x32xf32>
    %249 = arith.addf %243, %248 : vector<2x32xf32>
    %250 = vector.shape_cast %122 : vector<16x1xf32> to vector<2x8x1xf32>
    %c38 = arith.constant 38 : index
    %c96_69 = arith.constant 96 : index
    %251 = vector.load %arg3[%c38, %c96_69] : memref<96x128xf32, #tpu.memory_space<vmem>>, vector<1x32xf32>
    %252 = vector.shape_cast %251 : vector<1x32xf32> to vector<1x1x32xf32>
    %253 = vector.broadcast %250 : vector<2x8x1xf32> to vector<2x8x32xf32>
    %254 = vector.broadcast %252 : vector<1x1x32xf32> to vector<2x8x32xf32>
    %255 = arith.mulf %253, %254 : vector<2x8x32xf32>
    %256 = vector.shape_cast %249 : vector<2x32xf32> to vector<2x1x32xf32>
    %257 = vector.broadcast %256 : vector<2x1x32xf32> to vector<2x8x32xf32>
    %258 = arith.addf %255, %257 : vector<2x8x32xf32>
    %c35 = arith.constant 35 : index
    %c96_70 = arith.constant 96 : index
    %259 = vector.load %arg3[%c35, %c96_70] : memref<96x128xf32, #tpu.memory_space<vmem>>, vector<1x32xf32>
    %260 = vector.shape_cast %259 : vector<1x32xf32> to vector<1x1x32xf32>
    %261 = vector.broadcast %260 : vector<1x1x32xf32> to vector<2x8x32xf32>
    %262 = arith.addf %258, %261 : vector<2x8x32xf32>
    %cst_71 = arith.constant 0.000000e+00 : f32
    %263 = vector.broadcast %cst_71 : f32 to vector<2x8x32xf32>
    %264 = arith.maximumf %262, %263 : vector<2x8x32xf32>
    %265 = vector.shape_cast %264 : vector<2x8x32xf32> to vector<16x32xf32>
    %c0_72 = arith.constant 0 : index
    %c64_73 = arith.constant 64 : index
    %266 = vector.load %arg3[%c0_72, %c64_73] : memref<96x128xf32, #tpu.memory_space<vmem>>, vector<32x32xf32>
    %cst_74 = arith.constant dense<0.000000e+00> : vector<16x32xf32>
    %267 = tpu.matmul %265, %266, %cst_74 {dimension_numbers = #tpu.dot_dimension_numbers<[1], [0], [0], [1], [0, 0, 1, 1], [], []>} : vector<16x32xf32>, vector<32x32xf32>, vector<16x32xf32> -> vector<16x32xf32>
    %c36 = arith.constant 36 : index
    %c96_75 = arith.constant 96 : index
    %268 = vector.load %arg3[%c36, %c96_75] : memref<96x128xf32, #tpu.memory_space<vmem>>, vector<1x32xf32>
    %269 = vector.broadcast %268 : vector<1x32xf32> to vector<16x32xf32>
    %270 = arith.addf %267, %269 : vector<16x32xf32>
    %cst_76 = arith.constant 0.000000e+00 : f32
    %271 = vector.broadcast %cst_76 : f32 to vector<16x32xf32>
    %272 = arith.maximumf %270, %271 : vector<16x32xf32>
    %c32_77 = arith.constant 32 : index
    %c64_78 = arith.constant 64 : index
    %273 = vector.load %arg3[%c32_77, %c64_78] : memref<96x128xf32, #tpu.memory_space<vmem>>, vector<32x32xf32>
    %cst_79 = arith.constant dense<0.000000e+00> : vector<16x32xf32>
    %274 = tpu.matmul %272, %273, %cst_79 {dimension_numbers = #tpu.dot_dimension_numbers<[1], [0], [0], [1], [0, 0, 1, 1], [], []>} : vector<16x32xf32>, vector<32x32xf32>, vector<16x32xf32> -> vector<16x32xf32>
    %c37 = arith.constant 37 : index
    %c96_80 = arith.constant 96 : index
    %275 = vector.load %arg3[%c37, %c96_80] : memref<96x128xf32, #tpu.memory_space<vmem>>, vector<1x32xf32>
    %276 = vector.broadcast %275 : vector<1x32xf32> to vector<16x32xf32>
    %277 = arith.addf %274, %276 : vector<16x32xf32>
    %cst_81 = arith.constant 0.000000e+00 : f32
    %278 = vector.broadcast %cst_81 : f32 to vector<16x32xf32>
    %279 = arith.maximumf %277, %278 : vector<16x32xf32>
    %c39 = arith.constant 39 : index
    %c96_82 = arith.constant 96 : index
    %280 = vector.load %arg3[%c39, %c96_82] : memref<96x128xf32, #tpu.memory_space<vmem>>, vector<1x32xf32>
    %281 = vector.broadcast %280 : vector<1x32xf32> to vector<16x32xf32>
    %282 = arith.mulf %279, %281 : vector<16x32xf32>
    %cst_83 = arith.constant dense<0.000000e+00> : vector<16xf32>
    %283 = vector.multi_reduction <add>, %282, %cst_83 [1] : vector<16x32xf32> to vector<16xf32>
    %284 = vector.shape_cast %283 : vector<16xf32> to vector<16x1xf32>
    %c43 = arith.constant 43 : index
    %c96_84 = arith.constant 96 : index
    %285 = vector.load %arg3[%c43, %c96_84] : memref<96x128xf32, #tpu.memory_space<vmem>>, vector<1x1xf32>
    %286 = vector.broadcast %285 : vector<1x1xf32> to vector<16x1xf32>
    %287 = arith.addf %284, %286 : vector<16x1xf32>
    %288 = vector.shape_cast %7 : vector<16x1xf32> to vector<2x8x1xf32>
    %c0_85 = arith.constant 0 : index
    %c0_86 = arith.constant 0 : index
    %c0_87 = arith.constant 0 : index
    %c0_88 = arith.constant 0 : index
    %289 = vector.load %arg4[%c0_85, %c0_86, %c0_87, %c0_88] : memref<4x2x8x1xf32, #tpu.memory_space<vmem>>, vector<1x2x8x1xf32>
    %290 = vector.shape_cast %289 : vector<1x2x8x1xf32> to vector<2x8x1xf32>
    %291 = vector.shape_cast %288 : vector<2x8x1xf32> to vector<1x2x8x1xf32>
    tpu.vector_store %arg4[%c0_85, %c0_86, %c0_87, %c0_88], %291 {strides = array<i32>} : memref<4x2x8x1xf32, #tpu.memory_space<vmem>>, vector<1x2x8x1xf32>,
    %c1_89 = arith.constant 1 : index
    %c0_90 = arith.constant 0 : index
    %c0_91 = arith.constant 0 : index
    %c0_92 = arith.constant 0 : index
    %292 = vector.load %arg4[%c1_89, %c0_90, %c0_91, %c0_92] : memref<4x2x8x1xf32, #tpu.memory_space<vmem>>, vector<1x2x8x1xf32>
    %293 = vector.shape_cast %292 : vector<1x2x8x1xf32> to vector<2x8x1xf32>
    %294 = vector.shape_cast %120 : vector<2x8x1xf32> to vector<1x2x8x1xf32>
    tpu.vector_store %arg4[%c1_89, %c0_90, %c0_91, %c0_92], %294 {strides = array<i32>} : memref<4x2x8x1xf32, #tpu.memory_space<vmem>>, vector<1x2x8x1xf32>,
    %295 = vector.shape_cast %122 : vector<16x1xf32> to vector<2x8x1xf32>
    %c2 = arith.constant 2 : index
    %c0_93 = arith.constant 0 : index
    %c0_94 = arith.constant 0 : index
    %c0_95 = arith.constant 0 : index
    %296 = vector.load %arg4[%c2, %c0_93, %c0_94, %c0_95] : memref<4x2x8x1xf32, #tpu.memory_space<vmem>>, vector<1x2x8x1xf32>
    %297 = vector.shape_cast %296 : vector<1x2x8x1xf32> to vector<2x8x1xf32>
    %298 = vector.shape_cast %295 : vector<2x8x1xf32> to vector<1x2x8x1xf32>
    tpu.vector_store %arg4[%c2, %c0_93, %c0_94, %c0_95], %298 {strides = array<i32>} : memref<4x2x8x1xf32, #tpu.memory_space<vmem>>, vector<1x2x8x1xf32>,
    %299 = vector.shape_cast %287 : vector<16x1xf32> to vector<2x8x1xf32>
    %c3 = arith.constant 3 : index
    %c0_96 = arith.constant 0 : index
    %c0_97 = arith.constant 0 : index
    %c0_98 = arith.constant 0 : index
    %300 = vector.load %arg4[%c3, %c0_96, %c0_97, %c0_98] : memref<4x2x8x1xf32, #tpu.memory_space<vmem>>, vector<1x2x8x1xf32>
    %301 = vector.shape_cast %300 : vector<1x2x8x1xf32> to vector<2x8x1xf32>
    %302 = vector.shape_cast %299 : vector<2x8x1xf32> to vector<1x2x8x1xf32>
    tpu.vector_store %arg4[%c3, %c0_96, %c0_97, %c0_98], %302 {strides = array<i32>} : memref<4x2x8x1xf32, #tpu.memory_space<vmem>>, vector<1x2x8x1xf32>,
    return
  }
}

</mosaic_0001>

<bundles_post_ra>
// kernel: tpu_custom_call.1
= control target key start
LH: loop header
LB: loop body
LE: loop exit
PB: predicated region body
PF: predicated region fallthrough
CT: control target
= control target key end

     0   :  { %9 = vsyncpa [#allocation3], 0  ;;  %s1381_s0 = inlined_call_operand.hbm [shape: f32[2,8,16], index: 0, kind: input, shape index: {}]   ;;  %s1382_s1 = inlined_call_operand.hbm [shape: f32[2,8,16], index: 1, kind: input, shape index: {}]   ;;  %s1383_s2 = inlined_call_operand.hbm [shape: f32[2,2], index: 2, kind: input, shape index: {}]   ;;  %s1384_s3 = inlined_call_operand.hbm [shape: f32[96,128], index: 3, kind: input, shape index: {}]   ;;  %s1385_s4 = inlined_call_operand.vmem [shape: f32[4,2,8,1], index: 4, kind: output, shape index: {}]  }
   0x1   :  { %10 = vsyncpa [#allocation6], 0 }
   0x2   :  { %11 = vsyncpa [#allocation4], 0  ;;  %s29_s17 = sshll.u32 %s1382_s1, 4  ;;  %s1048_s18 = smov [#allocation5]   ;;  %s30_s17 = int_to_ptr.hbm [resolvable:$true] %s29_s17 }
   0x3   :  { %s31_s19 = sshll.u32 %s1048_s18, 4  ;;  %s16_s22 = sshll.u32 %s1381_s0, 4  ;;  %s32_s19 = int_to_ptr.vmem [resolvable:$true] %s31_s19  ;;  %s17_s22 = int_to_ptr.hbm [resolvable:$true] %s16_s22 }
   0x4   :  { %s1049_s23 = smov 128   ;;  %s1050_s24 = smov 8  }
   0x5   :  { %37 = dma.hbm_to_vmem [thread:$0]  %s30_s17, 256, %s32_s19, [#allocation6], %s1049_s23, %s1049_s23, %s1050_s24  }
   0x6   :  { %s1051_s25 = smov [#allocation2]   ;;  %s43_s29 = sshll.u32 %s1383_s2, 4  ;;  %s44_s29 = int_to_ptr.hbm [resolvable:$true] %s43_s29 }
   0x7   :  { %s18_s26 = sshll.u32 %s1051_s25, 4  ;;  %s51_s5 = sshll.u32 %s1384_s3, 4  ;;  %s19_s26 = int_to_ptr.vmem [resolvable:$true] %s18_s26  ;;  %s52_s5 = int_to_ptr.hbm [resolvable:$true] %s51_s5 }
   0x8   :  { %24 = dma.hbm_to_vmem [thread:$0]  %s17_s22, 256, %s19_s26, [#allocation3], %s1049_s23, %s1049_s23, %s1050_s24  }
   0x9   :  { %s1052_s6 = smov [#allocation7]   ;;  %s1053_s0 = smov [#allocation8]  }
   0xa   :  { %46 = dma.hbm_to_smem %s44_s29, 32, %s1052_s6, [#allocation4]  }
   0xb   :  { %s53_s7 = sshll.u32 %s1053_s0, 4  ;;  %s54_s7 = int_to_ptr.vmem [resolvable:$true] %s53_s7 }
   0xc   :  { %59 = dma.hbm_to_vmem [thread:$0]  %s52_s5, 1536, %s54_s7, [#allocation6], %s1049_s23, %s1049_s23, %s1050_s24  }
   0xd   :  { %1040 = dma.done.wait [#allocation3], 256  }
   0xe   :  { %1041 = vsyncadd [#allocation3], 4294967040 }
   0xf   :  { %1042 = dma.done.wait [#allocation6], 256  }
  0x10   :  { %1043 = vsyncadd [#allocation6], 4294967040 }
  0x11   :  { %1044 = dma.done.wait [#allocation4], 32  }
  0x12   :  { %1045 = vsyncadd [#allocation4], 4294967264 }
  0x13   :  { %1046 = dma.done.wait [#allocation6], 1536  }
  0x14   :  { %1047 = vsyncadd [#allocation6], 4294965760 }
  0x15   :  { %76 = sfence }
  0x16   :  { %v77_v0 = vld [vmem:[#allocation5] sm:$0xff]  ;;  %v79_v1 = vld [vmem:[#allocation2] sm:$0xff]  ;;  %vm83_vm0 = vcmask 130048   ;;  %v78_v3 = vld [vmem:[#allocation5 + $0x8] sm:$0xff]  ;;  %s1054_s2 = smov 32   ;;  %v1055_v11 = vmov 16.0   ;;  %v99_v26 = vlaneseq }
  0x17   :  { %v81_v2 = vsub.f32 %v77_v0, %v79_v1  ;;  %v144_v4 = vld [vmem:[#allocation8 + $0x10] sm:$0x7]  ;;  %v80_v5 = vld [vmem:[#allocation2 + $0x8] sm:$0xff]  ;;  %v941_v10 = vld [vmem:[#allocation8 + $0x20] ss:$0 sm:$0xff]  ;;  %952 = vrcp.f32 %v1055_v11  ;;  %vm784_vm2 = vcmask 7168  }
  0x18   :  { %v145_v6 = vperm.slane %v144_v4, 0  ;;  %v82_v8 = vsub.f32 %v78_v3, %v80_v5  ;;  %v152_v18 = vperm.slane %v144_v4, 1  ;;  %v165_v25 = vperm.slane %v144_v4, 2  ;;  %v1150_v40 = vld [vmem:[#allocation8 + $0x58] sm:$0xff]  ;;  %s1056_s11 = smov 64   ;;  %v228_v11 = vld [vmem:[#allocation8 + $0x50] sm:$0xff] }
  0x19   :  { %v84_v7 = vsel %vm83_vm0, %v81_v2, 0.0  ;;  %v1128_v27 = vshrl.u32 %v99_v26, 7  ;;  %247 = vmatpush.msra.mxu0 %v1150_v40  ;;  %s1057_s12 = smov 96   ;;  %vm212_vm9 = vcmask 261120   ;;  %vm215_vm10 = vcmask 523264   ;;  %s478_s13 = sld [smem:[#allocation7]] }
  0x1a   :  { %85 = vadd.xlane.f32.xlu0 %v84_v7  ;;  %147 = vrot.lane.b32.xlu1 %v145_v6, %s1054_s2  ;;  %v87_v9 = vsel %vm83_vm0, %v82_v8, 0.0  ;;  %vm236_vm11 = vcmask 785408   ;;  %s830_s14 = sld [smem:[#allocation7 + $0x1]]  ;;  %s1061_s17 = smov 48   ;;  %vm501_vm12 = vcmask 1040384   ;;  %vm412_vm14 = vcmask 1041409  }
  0x1b   :  { %v101_v28 = vadd.s32 8, %v1128_v27  ;;  %vm132_vm3 = vcmp.lt.s32.totalorder %v1128_v27, 1  ;;  %vm139_vm4 = vcmp.lt.s32.totalorder %v1128_v27, 7  ;;  %v106_v37 = vand.u32 7, %v1128_v27  ;;  %248 = vmatpush.msra.mxu0 %v228_v11  ;;  %s831_s15 = sld [smem:[#allocation7 + $0x80]] }
  0x1c   :  { %s832_s16 = sld [smem:[#allocation7 + $0x81]] }
  0x1d   :  { %v953_v12 = vpop.eup %952  ;;  %v113_v29 = vand.u32 7, %v101_v28  ;;  %vm1157_vm7 = vcmp.ne.s32.totalorder %v106_v37, 0  ;;  %vm1165_vm8 = vcmp.ne.s32.totalorder %v106_v37, 7 }
  0x1e   :  { %v91_v13 = vmul.f32 16.0, %v953_v12  ;;  %vm95_vm1 = vweird.f32 %v953_v12 }
  0x1f   :  { %vm1136_vm5 = vcmp.ne.s32.totalorder %v113_v29, 0  ;;  %vm1144_vm6 = vcmp.ne.s32.totalorder %v113_v29, 7 }
  0x20   :  { %v92_v14 = vsub.f32 1.0, %v91_v13  ;;  %v1189_v13 = vld [vmem:[#allocation8 + $0x40] sm:$0xff] }
  0x22   :  { %88 = vadd.xlane.f32.xlu0 %v87_v9  ;;  %v93_v15 = vmul.f32 %v953_v12, %v92_v14  ;;  %v225_v14 = vld [vmem:[#allocation8 + $0x38] sm:$0xff] }
  0x24   :  { %v94_v16 = vadd.f32 %v953_v12, %v93_v15  ;;  %v224_v15 = vld [vmem:[#allocation8 + $0x30] sm:$0xff] }
  0x25   :  { %v1207_v28 = vpack.i.bf16 %v224_v15, %v225_v14 }
  0x26   :  { %v96_v17 = vsel %vm95_vm1, %v953_v12, %v94_v16  ;;  %v227_v12 = vld [vmem:[#allocation8 + $0x48] sm:$0xff] }
  0x27   :  { %249 = vmatpush.msra.mxu0 %v227_v12  ;;  %v223_v16 = vld [vmem:[#allocation8 + $0x28] sm:$0xff]  ;;  %v868_v26 = vpack.i.bf16 %v1189_v13, %v227_v12 }
  0x29   :  { %250 = vmatpush.msra.mxu0 %v1189_v13 }
  0x2b   :  { %251 = vmatpush.msra.mxu0 %v225_v14 }
  0x2d   :  { %252 = vmatpush.msra.mxu0 %v224_v15  ;;  %v943_v15 = vld [vmem:[#allocation8 + $0x22] ss:$0 sm:$0xff] }
  0x2f   :  { %253 = vmatpush.msra.mxu0 %v223_v16 }
  0x36   :  { %177 = vrot.lane.b32.xlu0 %v941_v10, %s1054_s2 }
  0x3e   :  { %869 = vrot.lane.b32.xlu0 %v868_v26, %s1057_s12 }
  0x8c   :  { %v148_v41 = vpop.permute.xlu1 %147 }
  0x8d   :  { %v86_v19 = vpop.xlane.xlu0 %85 }
  0x8e   :  { %v1109_v20 = vmul.f32 %v96_v17, %v86_v19  ;;  %v220_v19 = vld [vmem:[#allocation8 + $0x10] sm:$0xff] }
  0x90   :  { %785 = vst.msk [vmem:[%s1385_s4] sm:$0xff] %vm784_vm2, %v1109_v20  ;;  %v153_v21 = vmul.f32 %v152_v18, %v1109_v20  ;;  %v130_v32 = vrot.slane %v1109_v20, 7  ;;  %v137_v36 = vrot.slane %v1109_v20, 1 }
  0x92   :  { %157 = vrot.lane.b32.xlu1 %v153_v21, %s1054_s2  ;;  %v1195_v21 = vld [vmem:[#allocation8 + $0x8] sm:$0xff] }
  0x95   :  { %v89_v22 = vpop.xlane.xlu0 %88 }
  0x96   :  { %v1118_v23 = vmul.f32 %v96_v17, %v89_v22  ;;  %v222_v17 = vld [vmem:[#allocation8 + $0x20] sm:$0xff] }
  0x97   :  { %254 = vmatpush.msra.mxu0 %v222_v17  ;;  %v1198_v22 = vld [vmem:[#allocation8] sm:$0xff]  ;;  %v1209_v29 = vpack.i.bf16 %v222_v17, %v223_v16  ;;  %v480_v16 = vstv %s478_s13  ;;  %v484_v17 = vstv %s830_s14 }
  0x98   :  { %786 = vst.msk [vmem:[%s1385_s4 + $0x8] sm:$0xff] %vm784_vm2, %v1118_v23  ;;  %v154_v24 = vmul.f32 %v152_v18, %v1118_v23  ;;  %v131_v30 = vrot.slane %v1118_v23, 7  ;;  %v138_v33 = vrot.slane %v1118_v23, 1  ;;  %v1192_v18 = vld [vmem:[#allocation8 + $0x18] sm:$0xff] }
  0x99   :  { %255 = vmatpush.msra.mxu0 %v1192_v18 }
  0x9a   :  { %159 = vrot.lane.b32.xlu2 %v154_v24, %s1054_s2  ;;  %v133_v35 = vsel %vm132_vm3, %v130_v32, %v131_v30  ;;  %v141_v39 = vsel %vm139_vm4, %v138_v33, %v137_v36  ;;  %v134_v46 = vsel %vm132_vm3, %v131_v30, %v130_v32  ;;  %v140_v52 = vsel %vm139_vm4, %v137_v36, %v138_v33  ;;  %v942_v24 = vld [vmem:[#allocation8 + $0x21] ss:$0 sm:$0xff] }
  0x9b   :  { %v136_v42 = vsel %vm1136_vm5, %v133_v35, 0.0  ;;  %v143_v44 = vsel %vm1144_vm6, %v141_v39, 0.0  ;;  %v135_v50 = vsel %vm1157_vm7, %v134_v46, 0.0  ;;  %v142_v56 = vsel %vm1165_vm8, %v140_v52, 0.0  ;;  %256 = vmatpush.msra.mxu0 %v220_v19 }
  0x9c   :  { %v151_v47 = vmul.f32 %v148_v41, %v136_v42  ;;  %v150_v55 = vmul.f32 %v148_v41, %v135_v50  ;;  %v1212_v30 = vpack.i.bf16 %v220_v19, %v1192_v18  ;;  %v1058_v19 = vmov 98  }
  0x9d   :  { %257 = vmatpush.msra.mxu0 %v1195_v21  ;;  %905 = vset.pattern.permute.xlu1 %v1058_v19 }
  0x9e   :  { %884 = vrot.lane.b32.xlu0 %v1212_v30, %s1057_s12 }
  0x9f   :  { %258 = vmatpush.msra.mxu0 %v1198_v22 }
  0xa2   :  { %167 = vrot.lane.b32.xlu2 %v165_v25, %s1054_s2  ;;  %v1202_v25 = vpack.i.bf16 %v228_v11, %v1150_v40 }
  0xa8   :  { %v178_v54 = vpop.permute.xlu0 %177 }
  0xf4   :  { %v160_v31 = vpop.permute.xlu2 %159 }
  0xf5   :  { %v164_v49 = vadd.f32 %v160_v31, %v151_v47  ;;  %v1219_v31 = vpack.i.bf16 %v1198_v22, %v1195_v21 }
  0xfc   :  { %v168_v43 = vpop.permute.xlu2 %167 }
  0xfd   :  { %v171_v48 = vmul.f32 %v168_v43, %v143_v44  ;;  %v170_v58 = vmul.f32 %v168_v43, %v142_v56 }
  0xff   :  { %v173_v53 = vadd.f32 %v171_v48, %v164_v49 }
 0x101   :  { %v181_v59 = vadd.f32 %v178_v54, %v173_v53 }
 0x103   :  { %v183_v62 = vmax.f32 %v181_v59, 0.0 }
 0x104   :  { %v158_v57 = vpop.permute.xlu1 %157 }
 0x105   :  { %v163_v60 = vadd.f32 %v158_v57, %v150_v55  ;;  %v185_v1 = vrot.slane %v183_v62, 7  ;;  %v191_v2 = vrot.slane %v183_v62, 1 }
 0x107   :  { %v172_v61 = vadd.f32 %v170_v58, %v163_v60 }
 0x109   :  { %v180_v63 = vadd.f32 %v178_v54, %v172_v61 }
 0x10b   :  { %v182_v0 = vmax.f32 %v180_v63, 0.0 }
 0x10d   :  { %198 = vrot.lane.b32.xlu1 %v182_v0, %s1054_s2  ;;  %v184_v3 = vrot.slane %v182_v0, 7  ;;  %v190_v4 = vrot.slane %v182_v0, 1 }
 0x10f   :  { %v192_v5 = vsel %vm139_vm4, %v190_v4, %v191_v2  ;;  %v187_v6 = vsel %vm132_vm3, %v185_v1, %v184_v3  ;;  %v186_v7 = vsel %vm132_vm3, %v184_v3, %v185_v1  ;;  %v193_v9 = vsel %vm139_vm4, %v191_v2, %v190_v4  ;;  %v870_v1 = vpop.permute.xlu0 %869 }
 0x110   :  { %v194_v8 = vsel %vm1165_vm8, %v192_v5, 0.0  ;;  %v195_v10 = vsel %vm1144_vm6, %v193_v9, 0.0  ;;  %v188_v35 = vsel %vm1157_vm7, %v187_v6, 0.0  ;;  %v189_v40 = vsel %vm1136_vm5, %v186_v7, 0.0 }
 0x111   :  { %206 = vrot.lane.b32.xlu2 %v194_v8, %s1056_s11  ;;  %v871_v27 = vunpack.i.l.bf16 %v870_v1  ;;  %v872_v3 = vunpack.i.h.bf16 %v870_v1  ;;  %v1065_v1 = vmov 101  }
 0x115   :  { %200 = vrot.lane.b32.xlu1 %v183_v62, %s1054_s2 }
 0x117   :  { %v885_v7 = vpop.permute.xlu0 %884 }
 0x118   :  { %v886_v9 = vunpack.i.l.bf16 %v885_v7 }
 0x119   :  { %208 = vrot.lane.b32.xlu2 %v195_v10, %s1056_s11  ;;  %v887_v10 = vunpack.i.h.bf16 %v885_v7  ;;  %v1067_v7 = vmov 8.0  }
 0x11a   :  { %954 = vrcp.f32 %v1067_v7 }
 0x11d   :  { %233 = vrot.lane.b32.xlu1 %v942_v24, %s1054_s2  ;;  %v479_v24 = vld [vmem:[#allocation8 + $0x13] sm:$0x1] }
 0x121   :  { %864 = vrot.lane.b32.xlu2 %v1202_v25, %s1057_s12 }
 0x125   :  { %874 = vrot.lane.b32.xlu1 %v1207_v28, %s1057_s12 }
 0x129   :  { %879 = vrot.lane.b32.xlu2 %v1209_v29, %s1057_s12 }
 0x12d   :  { %889 = vrot.lane.b32.xlu1 %v1219_v31, %s1057_s12 }
 0x16b   :  { %v207_v32 = vpop.permute.xlu2 %206 }
 0x173   :  { %v209_v41 = vpop.permute.xlu2 %208 }
 0x17b   :  { %v865_v63 = vpop.permute.xlu2 %864 }
 0x17c   :  { %v866_v0 = vunpack.i.l.bf16 %v865_v63  ;;  %v867_v2 = vunpack.i.h.bf16 %v865_v63 }
 0x17e   :  { %364 = vmatpush.msra.mxu1 %v866_v0 }
 0x17f   :  { %v199_v33 = vpop.permute.xlu1 %198 }
 0x180   :  { %v213_v36 = vsel %vm212_vm9, %v188_v35, %v199_v33  ;;  %365 = vmatpush.msra.mxu1 %v867_v2  ;;  %v493_v33 = vstv %s832_s16  ;;  %v481_v35 = vmul.f32 %v480_v16, %v479_v24  ;;  %v1066_v2 = vmov 103   ;;  %v955_v16 = vpop.eup %954 }
 0x181   :  { %v216_v37 = vsel %vm215_vm10, %v213_v36, %v207_v32  ;;  %v490_v32 = vstv %s831_s15  ;;  %vm404_vm13 = vweird.f32 %v955_v16 }
 0x182   :  { %825 = vmatmul.msk.f32.vlgmr.msra.gmra.mxu0 %vm236_vm11, %v216_v37  ;;  %366 = vmatpush.msra.mxu1 %v871_v27  ;;  %v491_v37 = vmul.f32 %v490_v32, %v479_v24 }
 0x183   :  { %v880_v5 = vpop.permute.xlu2 %879 }
 0x184   :  { %367 = vmatpush.msra.mxu1 %v872_v3  ;;  %v881_v6 = vunpack.i.l.bf16 %v880_v5  ;;  %v882_v8 = vunpack.i.h.bf16 %v880_v5 }
 0x187   :  { %v201_v39 = vpop.permute.xlu1 %200 }
 0x188   :  { %v214_v42 = vsel %vm212_vm9, %v189_v40, %v201_v39  ;;  %v477_v40 = vld [vmem:[#allocation8 + $0x29] sm:$0x1] }
 0x189   :  { %v217_v43 = vsel %vm215_vm10, %v214_v42, %v209_v41  ;;  %v1059_v42 = vmov 97  }
 0x18a   :  { %826 = vmatmul.msk.f32.gmra.mxu0 %vm236_vm11, %v217_v43  ;;  %904 = vset.pattern.permute.xlu0 %v1059_v42 }
 0x18f   :  { %v234_v44 = vpop.permute.xlu1 %233 }
 0x197   :  { %v875_v4 = vpop.permute.xlu1 %874 }
 0x198   :  { %v876_v38 = vunpack.i.l.bf16 %v875_v4  ;;  %v877_v51 = vunpack.i.h.bf16 %v875_v4 }
 0x19a   :  { %368 = vmatpush.msra.mxu1 %v876_v38 }
 0x19c   :  { %369 = vmatpush.msra.mxu1 %v877_v51 }
 0x19e   :  { %370 = vmatpush.msra.mxu1 %v881_v6 }
 0x19f   :  { %v890_v11 = vpop.permute.xlu1 %889 }
 0x1a0   :  { %371 = vmatpush.msra.mxu1 %v882_v8  ;;  %v891_v12 = vunpack.i.l.bf16 %v890_v11  ;;  %v892_v14 = vunpack.i.h.bf16 %v890_v11  ;;  %v509_v11 = vperm.slane %v1195_v21, 0 }
 0x1a2   :  { %372 = vmatpush.msra.mxu1 %v886_v9 }
 0x1a4   :  { %373 = vmatpush.msra.mxu1 %v887_v10 }
 0x1a6   :  { %374 = vmatpush.msra.mxu1 %v891_v12 }
 0x1a8   :  { %375 = vmatpush.msra.mxu1 %v892_v14  ;;  %v522_v14 = vperm.slane %v1195_v21, 2 }
 0x1ff   :  { %v260_v46 = vpop.f32.mrf.mxu0 }
 0x200   :  { %v261_v47 = vadd.f32 %v260_v46, %v234_v44  ;;  %v944_v46 = vld [vmem:[#allocation8 + $0x28] ss:$0 sm:$0xff] }
 0x202   :  { %v266_v48 = vmax.f32 %v261_v47, 0.0 }
 0x204   :  { %282 = vrot.lane.b32.xlu2 %v266_v48, %s1054_s2  ;;  %v268_v53 = vrot.slane %v266_v48, 7  ;;  %v274_v54 = vrot.slane %v266_v48, 1 }
 0x207   :  { %v263_v49 = vpop.f32.mrf.mxu0 }
 0x208   :  { %v264_v50 = vadd.f32 %v263_v49, %v234_v44  ;;  %v1060_v44 = vmov 96  }
 0x209   :  { %903 = vset.pattern.permute.xlu2 %v1060_v44 }
 0x20a   :  { %v267_v52 = vmax.f32 %v264_v50, 0.0 }
 0x20c   :  { %v269_v55 = vrot.slane %v267_v52, 7  ;;  %v275_v56 = vrot.slane %v267_v52, 1  ;;  %284 = vrot.lane.b32.xlu1 %v267_v52, %s1054_s2 }
 0x20e   :  { %v277_v57 = vsel %vm139_vm4, %v275_v56, %v274_v54  ;;  %v276_v58 = vsel %vm139_vm4, %v274_v54, %v275_v56  ;;  %v1240_v59 = vsel %vm132_vm3, %v269_v55, %v268_v53  ;;  %v1244_v60 = vsel %vm132_vm3, %v268_v53, %v269_v55 }
 0x20f   :  { %v279_v61 = vsel %vm1144_vm6, %v277_v57, 0.0  ;;  %v278_v62 = vsel %vm1165_vm8, %v276_v58, 0.0  ;;  %v272_v54 = vsel %vm1157_vm7, %v1240_v59, 0.0  ;;  %v1062_v57 = vmov 99  }
 0x210   :  { %292 = vrot.lane.b32.xlu2 %v279_v61, %s1056_s11  ;;  %290 = vrot.lane.b32.xlu0 %v278_v62, %s1056_s11  ;;  %v1063_v61 = vmov 100   ;;  %v1064_v62 = vmov 102   ;;  %v273_v45 = vsel %vm1136_vm5, %v1244_v60, 0.0 }
 0x214   :  { %894 = vrot.lane.b32.xlu1 %v1202_v25, %s1056_s11 }
 0x218   :  { %899 = vrot.lane.b32.xlu2 %v868_v26, %s1056_s11  ;;  %v483_v26 = vld [vmem:[#allocation8 + $0x14] sm:$0x1]  ;;  %351 = vrot.lane.b32.xlu0 %v943_v15, %s1054_s2  ;;  %v515_v15 = vperm.slane %v1195_v21, 1 }
 0x219   :  { %v485_v36 = vmul.f32 %v484_v17, %v483_v26  ;;  %v494_v39 = vmul.f32 %v493_v33, %v483_v26  ;;  %v529_v26 = vperm.slane %v1195_v21, 3 }
 0x21b   :  { %v486_v41 = vadd.f32 %v485_v36, %v481_v35  ;;  %v495_v43 = vadd.f32 %v494_v39, %v491_v37  ;;  %v400_v36 = vmul.f32 8.0, %v955_v16 }
 0x21c   :  { %461 = vrot.lane.b32.xlu1 %v1189_v13, %s1061_s17 }
 0x21d   :  { %v487_v47 = vadd.f32 %v486_v41, %v477_v40  ;;  %v496_v48 = vadd.f32 %v495_v43, %v477_v40 }
 0x21f   :  { %v488_v49 = vmax.f32 %v487_v47, 0.0  ;;  %v497_v50 = vmax.f32 %v496_v48, 0.0 }
 0x220   :  { %427 = vrot.lane.b32.xlu0 %v944_v46, %s1054_s2 }
 0x221   :  { %v499_v25 = vrot.slane %v497_v50, 7  ;;  %v543_v50 = vperm.slane %v1195_v21, 5 }
 0x223   :  { %v502_v52 = vsel %vm501_vm12, %v488_v49, %v499_v25  ;;  %v536_v49 = vperm.slane %v1195_v21, 4 }
 0x224   :  { %506 = vperm.xlu2 %903, %v502_v52   ;;  %519 = vperm.xlu1 %905, %v502_v52  }
 0x228   :  { %512 = vperm.xlu0 %904, %v502_v52  }
 0x22c   :  { %906 = vset.pattern.permute.xlu2 %v1062_v57  ;;  %907 = vset.pattern.permute.xlu1 %v1063_v61 }
 0x22d   :  { %526 = vperm.xlu2 %906, %v502_v52   ;;  %533 = vperm.xlu1 %907, %v502_v52  }
 0x230   :  { %909 = vset.pattern.permute.xlu0 %v1064_v62 }
 0x231   :  { %547 = vperm.xlu0 %909, %v502_v52  }
 0x235   :  { %908 = vset.pattern.permute.xlu2 %v1065_v1  ;;  %910 = vset.pattern.permute.xlu1 %v1066_v2 }
 0x236   :  { %540 = vperm.xlu2 %908, %v502_v52   ;;  %554 = vperm.xlu1 %910, %v502_v52   ;;  %v401_v52 = vsub.f32 1.0, %v400_v36 }
 0x239   :  { %911 = vset.pattern.permute.xlu0 %v1060_v44 }
 0x23e   :  { %913 = vset.pattern.permute.xlu2 %v1058_v19  ;;  %915 = vset.pattern.permute.xlu1 %v1063_v61 }
 0x25e   :  { %v283_v53 = vpop.permute.xlu2 %282 }
 0x25f   :  { %v296_v55 = vsel %vm212_vm9, %v272_v54, %v283_v53  ;;  %v550_v54 = vperm.slane %v1195_v21, 6 }
 0x26a   :  { %v293_v63 = vpop.permute.xlu2 %292 }
 0x272   :  { %v900_v3 = vpop.permute.xlu2 %899 }
 0x273   :  { %v901_v38 = vunpack.i.l.bf16 %v900_v3  ;;  %v902_v51 = vunpack.i.h.bf16 %v900_v3 }
 0x27e   :  { %v285_v58 = vpop.permute.xlu1 %284  ;;  %v507_v6 = vpop.permute.xlu2 %506 }
 0x27f   :  { %v297_v59 = vsel %vm212_vm9, %v273_v45, %v285_v58  ;;  %v510_v19 = vmul.f32 %v509_v11, %v507_v6  ;;  %v557_v6 = vperm.slane %v1195_v21, 7 }
 0x280   :  { %v299_v0 = vsel %vm215_vm10, %v297_v59, %v293_v63 }
 0x282   :  { %v291_v56 = vpop.permute.xlu0 %290 }
 0x283   :  { %v298_v13 = vsel %vm215_vm10, %v296_v55, %v291_v56 }
 0x284   :  { %827 = vmatmul.msk.f32.vlgmr.msra.gmra.mxu1 %vm236_vm11, %v298_v13 }
 0x286   :  { %v895_v34 = vpop.permute.xlu1 %894 }
 0x287   :  { %v896_v60 = vunpack.i.l.bf16 %v895_v34  ;;  %v897_v27 = vunpack.i.h.bf16 %v895_v34  ;;  %v527_v32 = vpop.permute.xlu2 %526  ;;  %v402_v34 = vmul.f32 %v955_v16, %v401_v52 }
 0x288   :  { %v530_v46 = vmul.f32 %v529_v26, %v527_v32 }
 0x289   :  { %444 = vmatpush.msra.mxu2 %v896_v60  ;;  %v403_v7 = vadd.f32 %v955_v16, %v402_v34 }
 0x28a   :  { %v352_v4 = vpop.permute.xlu0 %351 }
 0x28b   :  { %445 = vmatpush.msra.mxu2 %v897_v27 }
 0x28c   :  { %828 = vmatmul.msk.f32.gmra.mxu1 %vm236_vm11, %v299_v0 }
 0x28d   :  { %446 = vmatpush.msra.mxu2 %v901_v38 }
 0x28e   :  { %v1277_v5 = vpop.permute.xlu1 %461 }
 0x28f   :  { %447 = vmatpush.msra.mxu2 %v902_v51 }
 0x290   :  { %v541_v58 = vpop.permute.xlu2 %540 }
 0x291   :  { %v544_v63 = vmul.f32 %v543_v50, %v541_v58 }
 0x292   :  { %v1279_v8 = vpop.permute.xlu0 %427 }
 0x296   :  { %v520_v24 = vpop.permute.xlu1 %519 }
 0x297   :  { %v523_v37 = vmul.f32 %v522_v14, %v520_v24 }
 0x29a   :  { %v513_v35 = vpop.permute.xlu0 %512 }
 0x29b   :  { %v516_v39 = vmul.f32 %v515_v15, %v513_v35  ;;  %v945_v15 = vld [vmem:[#allocation8 + $0x2a] ss:$0 sm:$0xff] }
 0x29d   :  { %v517_v47 = vadd.f32 %v516_v39, %v510_v19  ;;  %v405_v19 = vsel %vm404_vm13, %v955_v16, %v403_v7 }
 0x29f   :  { %v524_v53 = vadd.f32 %v523_v37, %v517_v47  ;;  %v534_v56 = vpop.permute.xlu1 %533 }
 0x2a0   :  { %v537_v59 = vmul.f32 %v536_v49, %v534_v56  ;;  %v590_v56 = vperm.slane %v1198_v22, 3 }
 0x2a1   :  { %v531_v13 = vadd.f32 %v530_v46, %v524_v53 }
 0x2a3   :  { %v548_v0 = vpop.permute.xlu0 %547  ;;  %v538_v27 = vadd.f32 %v537_v59, %v531_v13  ;;  %v604_v59 = vperm.slane %v1198_v22, 5 }
 0x2a4   :  { %v551_v3 = vmul.f32 %v550_v54, %v548_v0 }
 0x2a5   :  { %v545_v51 = vadd.f32 %v544_v63, %v538_v27  ;;  %v618_v27 = vperm.slane %v1198_v22, 7 }
 0x2a8   :  { %v555_v11 = vpop.permute.xlu1 %554 }
 0x301   :  { %v377_v9 = vpop.f32.mrf.mxu1 }
 0x302   :  { %v378_v10 = vadd.f32 %v377_v9, %v352_v4 }
 0x304   :  { %v383_v12 = vmax.f32 %v378_v10, 0.0  ;;  %v552_v10 = vadd.f32 %v551_v3, %v545_v51 }
 0x306   :  { %v385_v17 = vsel %vm212_vm9, %v383_v12, 0.0 }
 0x307   :  { %v386_v33 = vrot.slane %v385_v17, 4 }
 0x309   :  { %v387_v40 = vadd.f32 %v386_v33, %v385_v17  ;;  %v380_v41 = vpop.f32.mrf.mxu1  ;;  %v558_v17 = vmul.f32 %v557_v6, %v555_v11 }
 0x30a   :  { %v381_v43 = vadd.f32 %v380_v41, %v352_v4 }
 0x30b   :  { %v388_v48 = vrot.slane %v387_v40, 2  ;;  %v559_v26 = vadd.f32 %v558_v17, %v552_v10 }
 0x30c   :  { %v384_v25 = vmax.f32 %v381_v43, 0.0 }
 0x30d   :  { %v389_v61 = vadd.f32 %v388_v48, %v387_v40  ;;  %v562_v35 = vadd.f32 %v945_v15, %v559_v26  ;;  %v947_v15 = vld [vmem:[#allocation8 + $0x23] ss:$0 sm:$0xff] }
 0x30e   :  { %v392_v55 = vsel %vm212_vm9, %v384_v25, 0.0  ;;  %v570_v25 = vperm.slane %v1198_v22, 0 }
 0x30f   :  { %v393_v45 = vrot.slane %v392_v55, 4  ;;  %v390_v4 = vrot.slane %v389_v61, 1  ;;  %v563_v37 = vmax.f32 %v562_v35, 0.0 }
 0x311   :  { %v394_v60 = vadd.f32 %v393_v45, %v392_v55  ;;  %v391_v12 = vadd.f32 %v390_v4, %v389_v61  ;;  %567 = vperm.xlu0 %911, %v563_v37   ;;  %594 = vperm.xlu1 %915, %v563_v37   ;;  %v597_v61 = vperm.slane %v1198_v22, 4 }
 0x312   :  { %580 = vperm.xlu2 %913, %v563_v37  }
 0x313   :  { %v395_v38 = vrot.slane %v394_v60, 2  ;;  %v406_v32 = vmul.f32 %v405_v19, %v391_v12 }
 0x315   :  { %v396_v9 = vadd.f32 %v395_v38, %v394_v60  ;;  %v611_v60 = vperm.slane %v1198_v22, 6 }
 0x317   :  { %v397_v14 = vrot.slane %v396_v9, 1 }
 0x319   :  { %v398_v24 = vadd.f32 %v397_v14, %v396_v9  ;;  %912 = vset.pattern.permute.xlu0 %v1059_v42  ;;  %919 = vset.pattern.permute.xlu1 %v1060_v44  ;;  %v946_v9 = vld [vmem:[#allocation8 + $0x26] ss:$0 sm:$0xff] }
 0x31a   :  { %573 = vperm.xlu0 %912, %v563_v37   ;;  %917 = vset.pattern.permute.xlu2 %v1064_v62 }
 0x31b   :  { %v407_v33 = vmul.f32 %v405_v19, %v398_v24  ;;  %608 = vperm.xlu2 %917, %v563_v37  }
 0x31d   :  { %v413_v36 = vsel %vm412_vm14, %v407_v33, %v406_v32 }
 0x31e   :  { %829 = vmatmul.msk.f32.vlgmr.msra.gmra.mxu2 %vm212_vm9, %v413_v36 }
 0x322   :  { %914 = vset.pattern.permute.xlu0 %v1062_v57 }
 0x323   :  { %587 = vperm.xlu0 %914, %v563_v37   ;;  %918 = vset.pattern.permute.xlu2 %v1066_v2 }
 0x32b   :  { %916 = vset.pattern.permute.xlu0 %v1065_v1 }
 0x32c   :  { %601 = vperm.xlu0 %916, %v563_v37  }
 0x334   :  { %920 = vset.pattern.permute.xlu0 %v1060_v44 }
 0x36c   :  { %v581_v44 = vpop.permute.xlu2 %580 }
 0x375   :  { %v609_v1 = vpop.permute.xlu2 %608 }
 0x376   :  { %v612_v38 = vmul.f32 %v611_v60, %v609_v1 }
 0x3a1   :  { %v449_v21 = vpop.f32.mrf.mxu2 }
 0x3a2   :  { %v450_v16 = vadd.f32 %v449_v21, %v1279_v8  ;;  %v595_v8 = vpop.permute.xlu1 %594  ;;  %v949_v21 = vld [vmem:[#allocation8 + $0x27] ss:$0 sm:$0xff] }
 0x3a3   :  { %v598_v45 = vmul.f32 %v597_v61, %v595_v8 }
 0x3a4   :  { %v452_v42 = vmax.f32 %v450_v16, 0.0 }
 0x3a6   :  { %v455_v39 = vrot.slane %v452_v42, 1  ;;  %v456_v40 = vperm.slane %v452_v42, 0 }
 0x3a8   :  { %v457_v41 = vperm.slane %v455_v39, 0  ;;  %v464_v62 = vmul.f32 %v1277_v5, %v456_v40 }
 0x3aa   :  { %v466_v43 = vsel %vm83_vm0, %v464_v62, 0.0  ;;  %v465_v57 = vmul.f32 %v1277_v5, %v457_v41 }
 0x3ab   :  { %467 = vadd.xlane.f32.xlu2 %v466_v43 }
 0x3ac   :  { %v469_v2 = vsel %vm83_vm0, %v465_v57, 0.0 }
 0x3ad   :  { %470 = vadd.xlane.f32.xlu1 %v469_v2 }
 0x3c3   :  { %615 = vperm.xlu2 %918, %v563_v37   ;;  %v948_v37 = vld [vmem:[#allocation8 + $0x24] ss:$0 sm:$0xff] }
 0x3cb   :  { %922 = vrot.lane.b32.xlu2 %v1212_v30, %s1056_s11  ;;  %v568_v30 = vpop.permute.xlu0 %567 }
 0x3cc   :  { %v571_v52 = vmul.f32 %v570_v25, %v568_v30 }
 0x41e   :  { %v468_v46 = vpop.xlane.xlu2 %467 }
 0x41f   :  { %v1307_v47 = vadd.f32 %v468_v46, %v1192_v18 }
 0x420   :  { %v471_v48 = vpop.xlane.xlu1 %470 }
 0x421   :  { %v1311_v49 = vsub.f32 %v1109_v20, %v1307_v47  ;;  %v1314_v5 = vadd.f32 %v471_v48, %v1192_v18  ;;  %v574_v20 = vpop.permute.xlu0 %573  ;;  %v576_v18 = vperm.slane %v1198_v22, 1 }
 0x423   :  { %v1318_v50 = vsub.f32 %v1118_v23, %v1314_v5  ;;  %624 = vperm.xlu1 %919, %v1311_v49   ;;  %v577_v53 = vmul.f32 %v576_v18, %v574_v20  ;;  %v583_v23 = vperm.slane %v1198_v22, 2  ;;  %v950_v20 = vld [vmem:[#allocation8 + $0x25] ss:$0 sm:$0xff] }
 0x425   :  { %629 = vperm.xlu0 %920, %v1318_v50   ;;  %v578_v55 = vadd.f32 %v577_v53, %v571_v52  ;;  %v584_v13 = vmul.f32 %v583_v23, %v581_v44 }
 0x426   :  { %v616_v3 = vpop.permute.xlu2 %615 }
 0x427   :  { %v619_v51 = vmul.f32 %v618_v27, %v616_v3 }
 0x429   :  { %v588_v54 = vpop.permute.xlu0 %587 }
 0x42a   :  { %v591_v58 = vmul.f32 %v590_v56, %v588_v54 }
 0x42b   :  { %927 = vrot.lane.b32.xlu1 %v1219_v31, %s1056_s11  ;;  %v585_v31 = vadd.f32 %v584_v13, %v578_v55 }
 0x42d   :  { %932 = vrot.lane.b32.xlu0 %v1207_v28, %s1056_s11  ;;  %v592_v28 = vadd.f32 %v591_v58, %v585_v31 }
 0x42e   :  { %v923_v16 = vpop.permute.xlu2 %922 }
 0x42f   :  { %v599_v0 = vadd.f32 %v598_v45, %v592_v28  ;;  %v924_v39 = vunpack.i.l.bf16 %v923_v16  ;;  %v925_v40 = vunpack.i.h.bf16 %v923_v16 }
 0x431   :  { %v602_v63 = vpop.permute.xlu0 %601  ;;  %696 = vmatpush.msra.mxu3 %v924_v39 }
 0x432   :  { %v605_v34 = vmul.f32 %v604_v59, %v602_v63 }
 0x433   :  { %697 = vmatpush.msra.mxu3 %v925_v40 }
 0x434   :  { %v606_v4 = vadd.f32 %v605_v34, %v599_v0  ;;  %v951_v34 = vld [vmem:[#allocation8 + $0x2b] ss:$0 sm:$0xff] }
 0x435   :  { %732 = vrot.lane.b32.xlu0 %v950_v20, %s1054_s2 }
 0x436   :  { %v613_v6 = vadd.f32 %v612_v38, %v606_v4 }
 0x438   :  { %v620_v7 = vadd.f32 %v619_v51, %v613_v6 }
 0x43a   :  { %v636_v10 = vrot.slane %v620_v7, 1  ;;  %v637_v12 = vperm.slane %v620_v7, 0 }
 0x43c   :  { %v638_v24 = vperm.slane %v636_v10, 0 }
 0x495   :  { %v625_v11 = vpop.permute.xlu1 %624 }
 0x496   :  { %v633_v14 = vmul.f32 %v946_v9, %v625_v11 }
 0x497   :  { %v630_v17 = vpop.permute.xlu0 %629 }
 0x498   :  { %v641_v19 = vadd.f32 %v637_v12, %v633_v14  ;;  %v634_v26 = vmul.f32 %v946_v9, %v630_v17 }
 0x49a   :  { %v642_v32 = vadd.f32 %v638_v24, %v634_v26  ;;  %v645_v33 = vadd.f32 %v947_v15, %v641_v19 }
 0x49c   :  { %v647_v35 = vmax.f32 %v645_v33, 0.0  ;;  %v646_v22 = vadd.f32 %v947_v15, %v642_v32 }
 0x49d   :  { %v928_v42 = vpop.permute.xlu1 %927 }
 0x49e   :  { %656 = vrot.lane.b32.xlu2 %v647_v35, %s1054_s2  ;;  %v648_v36 = vmax.f32 %v646_v22, 0.0  ;;  %v929_v41 = vunpack.i.l.bf16 %v928_v42 }
 0x49f   :  { %v933_v2 = vpop.permute.xlu0 %932 }
 0x4a0   :  { %658 = vrot.lane.b32.xlu1 %v648_v36, %s1054_s2  ;;  %698 = vmatpush.msra.mxu3 %v929_v41  ;;  %v934_v44 = vunpack.i.l.bf16 %v933_v2 }
 0x4a2   :  { %753 = vmatpush.msrb.mxu2 %v934_v44 }
 0x4a6   :  { %677 = vrot.lane.b32.xlu2 %v948_v37, %s1054_s2 }
 0x4a7   :  { %v733_v55 = vpop.permute.xlu0 %732 }
 0x4a8   :  { %937 = vrot.lane.b32.xlu1 %v1209_v29, %s1056_s11  ;;  %v930_v29 = vunpack.i.h.bf16 %v928_v42 }
 0x4aa   :  { %699 = vmatpush.msra.mxu3 %v930_v29 }
 0x4ae   :  { %769 = vrot.lane.b32.xlu2 %v949_v21, %s1054_s2 }
 0x4b6   :  { %789 = vrot.lane.b32.xlu2 %v1307_v47, %s1054_s2 }
 0x4be   :  { %791 = vrot.lane.b32.xlu2 %v1314_v5, %s1054_s2  ;;  %v935_v5 = vunpack.i.h.bf16 %v933_v2 }
 0x4c0   :  { %754 = vmatpush.msrb.mxu2 %v935_v5 }
 0x4c6   :  { %798 = vrot.lane.b32.xlu2 %v1311_v49, %s1054_s2 }
 0x4ce   :  { %800 = vrot.lane.b32.xlu2 %v1318_v50, %s1054_s2 }
 0x4f8   :  { %v657_v62 = vpop.permute.xlu2 %656 }
 0x4f9   :  { %833 = vmatmul.msk.f32.vlgmr.msra.gmra.mxu3 %vm212_vm9, %v657_v62 }
 0x500   :  { %v678_v43 = vpop.permute.xlu2 %677 }
 0x508   :  { %v770_v57 = vpop.permute.xlu2 %769 }
 0x510   :  { %v790_v1 = vpop.permute.xlu2 %789 }
 0x511   :  { %837 = vst.msk [vmem:[%s1385_s4 + $0x10] sm:$0xff] %vm784_vm2, %v790_v1 }
 0x512   :  { %v659_v8 = vpop.permute.xlu1 %658 }
 0x513   :  { %834 = vmatmul.msk.f32.gmra.mxu3 %vm212_vm9, %v659_v8 }
 0x518   :  { %v792_v46 = vpop.permute.xlu2 %791 }
 0x519   :  { %838 = vst.msk [vmem:[%s1385_s4 + $0x18] sm:$0xff] %vm784_vm2, %v792_v46 }
 0x51a   :  { %v938_v49 = vpop.permute.xlu1 %937 }
 0x51b   :  { %v939_v50 = vunpack.i.l.bf16 %v938_v49  ;;  %v940_v30 = vunpack.i.h.bf16 %v938_v49 }
 0x51d   :  { %755 = vmatpush.msrb.mxu2 %v939_v50 }
 0x51f   :  { %756 = vmatpush.msrb.mxu2 %v940_v30 }
 0x520   :  { %v799_v47 = vpop.permute.xlu2 %798 }
 0x521   :  { %839 = vst.msk [vmem:[%s1385_s4 + $0x20] sm:$0xff] %vm784_vm2, %v799_v47 }
 0x528   :  { %v801_v48 = vpop.permute.xlu2 %800 }
 0x529   :  { %840 = vst.msk [vmem:[%s1385_s4 + $0x28] sm:$0xff] %vm784_vm2, %v801_v48 }
 0x57c   :  { %v701_v25 = vpop.f32.mrf.mxu3 }
 0x57d   :  { %v702_v18 = vadd.f32 %v701_v25, %v678_v43 }
 0x57f   :  { %v707_v52 = vmax.f32 %v702_v18, 0.0 }
 0x581   :  { %835 = vmatmul.msk.f32.vlgmr.msrb.gmra.mxu2 %vm212_vm9, %v707_v52 }
 0x596   :  { %v704_v53 = vpop.f32.mrf.mxu3 }
 0x597   :  { %v705_v23 = vadd.f32 %v704_v53, %v678_v43 }
 0x599   :  { %v708_v54 = vmax.f32 %v705_v23, 0.0 }
 0x59b   :  { %836 = vmatmul.msk.f32.gmra.mxu2 %vm212_vm9, %v708_v54 }
 0x604   :  { %v758_v56 = vpop.f32.mrf.mxu2 }
 0x605   :  { %v759_v13 = vadd.f32 %v758_v56, %v733_v55 }
 0x607   :  { %v764_v58 = vmax.f32 %v759_v13, 0.0 }
 0x609   :  { %v772_v31 = vmul.f32 %v770_v57, %v764_v58 }
 0x60b   :  { %v774_v61 = vsel %vm212_vm9, %v772_v31, 0.0 }
 0x60c   :  { %775 = vadd.xlane.f32.xlu1 %v774_v61 }
 0x61e   :  { %v761_v28 = vpop.f32.mrf.mxu2 }
 0x61f   :  { %v762_v45 = vadd.f32 %v761_v28, %v733_v55 }
 0x621   :  { %v765_v59 = vmax.f32 %v762_v45, 0.0 }
 0x623   :  { %v773_v63 = vmul.f32 %v770_v57, %v765_v59 }
 0x625   :  { %v777_v0 = vsel %vm212_vm9, %v773_v63, 0.0 }
 0x626   :  { %778 = vadd.xlane.f32.xlu0 %v777_v0 }
 0x67f   :  { %v776_v60 = vpop.xlane.xlu1 %775 }
 0x680   :  { %v782_v27 = vadd.f32 %v951_v34, %v776_v60 }
 0x682   :  { %809 = vrot.lane.b32.xlu2 %v782_v27, %s1054_s2 }
 0x699   :  { %v779_v3 = vpop.xlane.xlu0 %778 }
 0x69a   :  { %v783_v4 = vadd.f32 %v951_v34, %v779_v3 }
 0x69c   :  { %811 = vrot.lane.b32.xlu1 %v783_v4, %s1054_s2 }
 0x6dc   :  { %v810_v38 = vpop.permute.xlu2 %809 }
 0x6dd   :  { %841 = vst.msk [vmem:[%s1385_s4 + $0x30] sm:$0xff] %vm784_vm2, %v810_v38 }
 0x70e   :  { %v812_v51 = vpop.permute.xlu1 %811 }
 0x70f   :  { %842 = vst.msk [vmem:[%s1385_s4 + $0x38] sm:$0xff] %vm784_vm2, %v812_v51 }
 0x710   :  { %822 = vsyncpa [#allocation3], 1 }
 0x711   :  { %823 = vsyncpa [#allocation6], 1 }
 0x712   :  { %824 = vsyncpa [#allocation4], 1 }

</bundles_post_ra>
